<compile_context>
chip_gen: v7x
topology: tpu7x:2x2x1
jax: 0.10.0
libtpu: 0.0.40
codegen_flags: <defaults>
</compile_context>

<pallas_src>
import math

import jax
import jax.numpy as jnp
from jax import lax
from jax.experimental import pallas as pl
from jax.experimental.pallas import tpu as pltpu


# ---------------------------------------------------------------------------
# Pallas kernel: one (batch-tile, layer) step of the text-encoder forward.
# ---------------------------------------------------------------------------
def make_kernel(S, S_pad, D, DFF, H, L, BB):
    HD = D // H
    M = BB * S_pad
    scale = 1.0 / math.sqrt(HD)

    def layer_norm(x, g, b):
        m = jnp.mean(x, axis=-1, keepdims=True)
        v = jnp.mean((x - m) ** 2, axis=-1, keepdims=True)
        return (x - m) * lax.rsqrt(v + 1e-5) * g + b

    def kernel(eot_ref,                                      # scalar prefetch (SMEM)
               prompts_ref, pos_ref,
               wqkv_ref, wo_ref, wfc_ref, wpr_ref,
               vecs_ref, lnf_ref, tproj_ref,
               out_ref,
               x_sc, mask_sc, attn_sc, eot_sc):
        b = pl.program_id(0)
        l = pl.program_id(1)

        # ---- first layer of this batch tile: init activations + additive mask ----
        @pl.when(l == 0)
        def _init():
            # single full-block store (no per-row partial stores / broadcasts)
            x_sc[...] = (prompts_ref[...] + pos_ref[...][None]).reshape(M, D)
            row = lax.broadcasted_iota(jnp.int32, (S_pad, S_pad), 0)
            col = lax.broadcasted_iota(jnp.int32, (S_pad, S_pad), 1)
            keep = jnp.logical_and(col <= row, col < S)      # causal + key padding
            mask_sc[...] = jnp.where(keep, 0.0, -1e30).astype(jnp.float32)

        # ---- packed per-layer vectors (one DMA) -----------------------------------
        vecs = vecs_ref[0]                                   # (8, Cmax) f32
        ln1_g, ln1_b = vecs[0:1, :D], vecs[1:2, :D]
        ln2_g, ln2_b = vecs[2:3, :D], vecs[3:4, :D]
        bo, bpr = vecs[4:5, :D], vecs[5:6, :D]
        bfc = vecs[6:7, :DFF]
        bqkv = vecs[7:8, :3 * D]

        # ---- residual attention block for layer l ---------------------------------
        x = x_sc[...]                                        # (M, D) f32
        xn = layer_norm(x, ln1_g, ln1_b)
        xnb = xn.astype(jnp.bfloat16)

        # fused QKV matmul; fold the 1/sqrt(HD) scale into q; cast to bf16 once
        qkv = jnp.dot(xnb, wqkv_ref[0], preferred_element_type=jnp.float32) + bqkv
        q = (qkv[:, :D] * scale).astype(jnp.bfloat16)
        k = qkv[:, D:2 * D].astype(jnp.bfloat16)
        v = qkv[:, 2 * D:3 * D].astype(jnp.bfloat16)

        # mask broadcast hoisted out of the head loop
        mask_b = jnp.broadcast_to(mask_sc[...][None, :, :], (BB, S_pad, S_pad))

        for hh in range(H):                                  # heads -> bf16 scratch
            hs = slice(hh * HD, (hh + 1) * HD)
            qh = q[:, hs].reshape(BB, S_pad, HD)
            kh = k[:, hs].reshape(BB, S_pad, HD)
            vh = v[:, hs].reshape(BB, S_pad, HD)
            s = jnp.einsum('bqd,bkd->bqk', qh, kh,
                           preferred_element_type=jnp.float32) + mask_b
            mx = jnp.max(s, axis=-1, keepdims=True)
            p = jnp.exp(s - mx)
            p = p * pl.reciprocal(jnp.sum(p, axis=-1, keepdims=True), approx=True)
            oh = jnp.einsum('bqk,bkd->bqd', p.astype(jnp.bfloat16), vh,
                            preferred_element_type=jnp.float32)   # (BB, S_pad, HD)
            attn_sc[:, hs] = oh.reshape(M, HD).astype(jnp.bfloat16)

        # single output-projection matmul with full K = D depth on the MXU
        attn = jnp.dot(attn_sc[...], wo_ref[0], preferred_element_type=jnp.float32)
        x = x + attn + bo

        # MLP with QuickGELU: x * sigmoid(1.702 x); gate in bf16 (matmul eats bf16)
        xn = layer_norm(x, ln2_g, ln2_b)
        h = jnp.dot(xn.astype(jnp.bfloat16), wfc_ref[0],
                    preferred_element_type=jnp.float32) + bfc
        h = h.astype(jnp.bfloat16)
        h = h * jax.nn.sigmoid(1.702 * h)
        mlp = jnp.dot(h, wpr_ref[0], preferred_element_type=jnp.float32) + bpr
        x = x + mlp
        x_sc[...] = x

        # ---- last layer: gather EOT rows, one LN, one projection, one dense store --
        @pl.when(l == L - 1)
        def _final():
            for r in range(BB):
                e = eot_ref[b * BB + r]                          # SMEM scalar (< S)
                eot_sc[r:r + 1, :] = x_sc[pl.ds(r * S_pad + e, 1), :]
            rows = layer_norm(eot_sc[...], lnf_ref[0:1, :], lnf_ref[1:2, :])
            out_ref[...] = jnp.dot(rows.astype(jnp.bfloat16), tproj_ref[...],
                                   preferred_element_type=jnp.float32)

    return kernel


# ---------------------------------------------------------------------------
# Wrapper: padding, weight packing (bf16, in-dim major), pallas_call setup
# ---------------------------------------------------------------------------
def text_encoder_pallas(prompts, tokenized, params, *, H, BB=None,
                        vmem_limit_bytes=48 * 1024 * 1024):
    B, S, D = prompts.shape
    L, DFF, _ = params['wfc'].shape
    E = params['tproj'].shape[1]
    assert D % H == 0

    S_pad = -(-S // 8) * 8
    if BB is None:
        # Primary perf knob: per-layer arithmetic intensity is M = BB * S_pad
        # flops per weight byte.  BB=8 is past the bf16 roofline crossover on
        # v5e/v7x and close on v6e; raise to 12-16 on v6e (and raise vmem_limit).
        BB = min(B, 8)
    n_bt = -(-B // BB)
    if n_bt > 1 and BB % 8 != 0:
        BB = -(-BB // 8) * 8            # keep the (BB, E) output block sublane-aligned
        n_bt = -(-B // BB)
    B_pad = n_bt * BB

    f32 = jnp.float32
    prompts_p = jnp.pad(prompts.astype(f32),
                        ((0, B_pad - B), (0, S_pad - S), (0, 0)))
    pos_p = jnp.pad(params['pos'].astype(f32), ((0, S_pad - S), (0, 0)))

    # EOT index per row (argmax of token ids) -> scalar prefetch; always < S.
    eot = jnp.argmax(tokenized, axis=-1).astype(jnp.int32)
    eot = jnp.pad(eot, (0, B_pad - B))

    # Weights: pre-transpose to (in_dim, out_dim), cast to bf16; QKV fused.
    wdt = jnp.bfloat16
    tr = lambda w: jnp.transpose(w, (0, 2, 1)).astype(wdt)
    wqkv = jnp.concatenate([tr(params['wq']), tr(params['wk']), tr(params['wv'])],
                           axis=-1)                              # (L, D, 3D)
    wo = tr(params['wo'])                                        # (L, D, D)
    wfc = tr(params['wfc'])                                      # (L, D, DFF)
    wpr = tr(params['wpr'])                                      # (L, DFF, D)
    tproj = params['tproj'].astype(wdt)                          # (D, E)
    lnf = jnp.concatenate([params['lnf_g'], params['lnf_b']], axis=0).astype(f32)

    # Pack all small per-layer vectors into one (L, 8, Cmax) array (one DMA/layer).
    NV = 8
    Cmax = -(-max(3 * D, DFF) // 128) * 128
    vecs = jnp.zeros((L, NV, Cmax), f32)
    vecs = vecs.at[:, 0, :D].set(params['ln1_g'].astype(f32))
    vecs = vecs.at[:, 1, :D].set(params['ln1_b'].astype(f32))
    vecs = vecs.at[:, 2, :D].set(params['ln2_g'].astype(f32))
    vecs = vecs.at[:, 3, :D].set(params['ln2_b'].astype(f32))
    vecs = vecs.at[:, 4, :D].set(params['bo'].astype(f32))
    vecs = vecs.at[:, 5, :D].set(params['bpr'].astype(f32))
    vecs = vecs.at[:, 6, :DFF].set(params['bfc'].astype(f32))
    vecs = vecs.at[:, 7, :3 * D].set(
        jnp.concatenate([params['bq'], params['bk'], params['bv']], axis=-1).astype(f32))

    in_specs = [
        pl.BlockSpec((BB, S_pad, D), lambda b, l, eot_r: (b, 0, 0)),    # prompts
        pl.BlockSpec((S_pad, D),     lambda b, l, eot_r: (0, 0)),       # positional emb
        pl.BlockSpec((1, D, 3 * D),  lambda b, l, eot_r: (l, 0, 0)),    # wqkv
        pl.BlockSpec((1, D, D),      lambda b, l, eot_r: (l, 0, 0)),    # wo
        pl.BlockSpec((1, D, DFF),    lambda b, l, eot_r: (l, 0, 0)),    # wfc
        pl.BlockSpec((1, DFF, D),    lambda b, l, eot_r: (l, 0, 0)),    # wpr
        pl.BlockSpec((1, NV, Cmax),  lambda b, l, eot_r: (l, 0, 0)),    # packed vectors
        pl.BlockSpec((2, D),         lambda b, l, eot_r: (0, 0)),       # ln_final g/b
        pl.BlockSpec((D, E),         lambda b, l, eot_r: (0, 0)),       # text_projection
    ]

    grid_spec = pltpu.PrefetchScalarGridSpec(
        num_scalar_prefetch=1,
        grid=(n_bt, L),
        in_specs=in_specs,
        out_specs=pl.BlockSpec((BB, E), lambda b, l, eot_r: (b, 0)),
        scratch_shapes=[
            pltpu.VMEM((BB * S_pad, D), jnp.float32),    # activations across layers
            pltpu.VMEM((S_pad, S_pad), jnp.float32),     # additive causal/pad mask
            pltpu.VMEM((BB * S_pad, D), jnp.bfloat16),   # per-head outputs (bf16)
            pltpu.VMEM((BB, D), jnp.float32),            # gathered EOT rows
        ],
    )

    out = pl.pallas_call(
        make_kernel(S, S_pad, D, DFF, H, L, BB),
        out_shape=jax.ShapeDtypeStruct((B_pad, E), jnp.float32),
        grid_spec=grid_spec,
        compiler_params=pltpu.CompilerParams(
            dimension_semantics=("parallel", "arbitrary"),
            vmem_limit_bytes=vmem_limit_bytes,
        ),
    )(eot, prompts_p, pos_p, wqkv, wo, wfc, wpr, vecs, lnf, tproj)
    return out[:B]


# ---------------------------------------------------------------------------
# Pure-JAX reference (mirrors the PyTorch forward, f32) for a correctness check
# ---------------------------------------------------------------------------
def text_encoder_ref(prompts, tokenized, params, *, H):
    B, S, D = prompts.shape
    L = params['wq'].shape[0]
    HD = D // H
    scale = 1.0 / math.sqrt(HD)

    def ln(x, g, b):
        m = jnp.mean(x, -1, keepdims=True)
        v = jnp.mean((x - m) ** 2, -1, keepdims=True)
        return (x - m) * lax.rsqrt(v + 1e-5) * g + b

    causal = jnp.where(jnp.arange(S)[None, :] <= jnp.arange(S)[:, None], 0.0, -1e30)
    x = prompts + params['pos'][None]
    for l in range(L):
        xn = ln(x, params['ln1_g'][l], params['ln1_b'][l])
        q = xn @ params['wq'][l].T + params['bq'][l]
        k = xn @ params['wk'][l].T + params['bk'][l]
        v = xn @ params['wv'][l].T + params['bv'][l]
        q = q.reshape(B, S, H, HD); k = k.reshape(B, S, H, HD); v = v.reshape(B, S, H, HD)
        sc = jnp.einsum('bqhd,bkhd->bhqk', q, k) * scale + causal
        p = jax.nn.softmax(sc, axis=-1)
        o = jnp.einsum('bhqk,bkhd->bqhd', p, v).reshape(B, S, D)
        x = x + (o @ params['wo'][l].T + params['bo'][l])
        xn = ln(x, params['ln2_g'][l], params['ln2_b'][l])
        h = xn @ params['wfc'][l].T + params['bfc'][l]
        h = h * jax.nn.sigmoid(1.702 * h)
        x = x + (h @ params['wpr'][l].T + params['bpr'][l])
    x = ln(x, params['lnf_g'][0], params['lnf_b'][0])
    eot = jnp.argmax(tokenized, axis=-1)
    sel = x[jnp.arange(B), eot]
    return sel @ params['tproj']


# ---------------------------------------------------------------------------
# Deterministic synthetic parameters (PyTorch weight layout: (out_dim, in_dim))
# ---------------------------------------------------------------------------
def init_params(key, *, S, D, H, L, E, DFF):
    ks = jax.random.split(key, 20)
    s = 0.02
    return {
        'pos':   s * jax.random.normal(ks[0], (S, D), jnp.float32),
        'ln1_g': 1.0 + s * jax.random.normal(ks[1], (L, D), jnp.float32),
        'ln1_b': s * jax.random.normal(ks[2], (L, D), jnp.float32),
        'wq':    s * jax.random.normal(ks[3], (L, D, D), jnp.float32),
        'wk':    s * jax.random.normal(ks[4], (L, D, D), jnp.float32),
        'wv':    s * jax.random.normal(ks[5], (L, D, D), jnp.float32),
        'bq':    s * jax.random.normal(ks[6], (L, D), jnp.float32),
        'bk':    s * jax.random.normal(ks[7], (L, D), jnp.float32),
        'bv':    s * jax.random.normal(ks[8], (L, D), jnp.float32),
        'wo':    s * jax.random.normal(ks[9], (L, D, D), jnp.float32),
        'bo':    s * jax.random.normal(ks[10], (L, D), jnp.float32),
        'ln2_g': 1.0 + s * jax.random.normal(ks[11], (L, D), jnp.float32),
        'ln2_b': s * jax.random.normal(ks[12], (L, D), jnp.float32),
        'wfc':   s * jax.random.normal(ks[13], (L, DFF, D), jnp.float32),
        'bfc':   s * jax.random.normal(ks[14], (L, DFF), jnp.float32),
        'wpr':   s * jax.random.normal(ks[15], (L, D, DFF), jnp.float32),
        'bpr':   s * jax.random.normal(ks[16], (L, D), jnp.float32),
        'lnf_g': 1.0 + s * jax.random.normal(ks[17], (1, D), jnp.float32),
        'lnf_b': s * jax.random.normal(ks[18], (1, D), jnp.float32),
        'tproj': s * jax.random.normal(ks[19], (D, E), jnp.float32),
    }


if __name__ == "__main__":
    B, S, D, H, L, E = 2, 10, 32, 4, 2, 32
    DFF = 4 * D

    key = jax.random.PRNGKey(0)
    kp, kprompt, ktok = jax.random.split(key, 3)

    params = init_params(kp, S=S, D=D, H=H, L=L, E=E, DFF=DFF)

    # prompts: learned context embeddings + token embeddings, (B, S, D)
    prompts = 0.02 * jax.random.normal(kprompt, (B, S, D), jnp.float32)

    # tokenized prompt ids; EOT token (largest id) at different positions per row
    tokenized = jax.random.randint(ktok, (B, S), 1, 100, jnp.int32)
    tokenized = tokenized.at[0, 5].set(49407).at[1, 7].set(49407)

    out = text_encoder_pallas(prompts, tokenized, params, H=H)
    out = jax.block_until_ready(out)

    ref = text_encoder_ref(prompts, tokenized, params, H=H)
    assert out.shape == (B, E)
    assert jnp.allclose(out, ref, atol=2e-2, rtol=2e-2), "mismatch vs JAX reference"

    print("KERNEL_OK")
</pallas_src>

<mosaic_0001>
module attributes {stable_mosaic.version = 11 : i64} {
  func.func @kernel(%arg0: i32, %arg1: i32, %arg2: memref<2xi32, #tpu.memory_space<smem>>, %arg3: memref<2x16x32xf32, #tpu.memory_space<vmem>>, %arg4: memref<16x32xf32, #tpu.memory_space<vmem>>, %arg5: memref<1x32x96xbf16, #tpu.memory_space<vmem>>, %arg6: memref<1x32x32xbf16, #tpu.memory_space<vmem>>, %arg7: memref<1x32x128xbf16, #tpu.memory_space<vmem>>, %arg8: memref<1x128x32xbf16, #tpu.memory_space<vmem>>, %arg9: memref<1x8x128xf32, #tpu.memory_space<vmem>>, %arg10: memref<2x32xf32, #tpu.memory_space<vmem>>, %arg11: memref<32x32xbf16, #tpu.memory_space<vmem>>, %arg12: memref<2x32xf32, #tpu.memory_space<vmem>>, %arg13: memref<32x32xf32, #tpu.memory_space<vmem>>, %arg14: memref<16x16xf32, #tpu.memory_space<vmem>>, %arg15: memref<32x32xbf16, #tpu.memory_space<vmem>>, %arg16: memref<2x32xf32, #tpu.memory_space<vmem>>) attributes {dimension_semantics = [#tpu.dimension_semantics<parallel>, #tpu.dimension_semantics<arbitrary>], iteration_bounds = array<i64: 1, 2>, scalar_prefetch = 1 : i64, scratch_operands = 4 : i64, tpu.core_type = #tpu.core_type<tc>, window_params = [{transform_indices = @transform_0, window_bounds = array<i64: 2, 16, 32>}, {pipeline_mode = #tpu.pipeline_mode<synchronous>, transform_indices = @transform_1, window_bounds = array<i64: 16, 32>}, {transform_indices = @transform_2, window_bounds = array<i64: 1, 32, 96>}, {transform_indices = @transform_3, window_bounds = array<i64: 1, 32, 32>}, {transform_indices = @transform_4, window_bounds = array<i64: 1, 32, 128>}, {transform_indices = @transform_5, window_bounds = array<i64: 1, 128, 32>}, {transform_indices = @transform_6, window_bounds = array<i64: 1, 8, 128>}, {pipeline_mode = #tpu.pipeline_mode<synchronous>, transform_indices = @transform_7, window_bounds = array<i64: 2, 32>}, {pipeline_mode = #tpu.pipeline_mode<synchronous>, transform_indices = @transform_8, window_bounds = array<i64: 32, 32>}, {transform_indices = @transform_9, window_bounds = array<i64: 2, 32>}]} {
    %c0_i32 = arith.constant 0 : i32
    %0 = arith.cmpi eq, %arg1, %c0_i32 : i32
    %1 = arith.extui %0 : i1 to i32
    %c0_i32_0 = arith.constant 0 : i32
    %2 = arith.cmpi ne, %1, %c0_i32_0 : i32
    scf.if %2 {
      %c0_61 = arith.constant 0 : index
      %c0_62 = arith.constant 0 : index
      %c0_63 = arith.constant 0 : index
      %200 = vector.load %arg3[%c0_61, %c0_62, %c0_63] : memref<2x16x32xf32, #tpu.memory_space<vmem>>, vector<2x16x32xf32>
      %c0_64 = arith.constant 0 : index
      %c0_65 = arith.constant 0 : index
      %201 = vector.load %arg4[%c0_64, %c0_65] : memref<16x32xf32, #tpu.memory_space<vmem>>, vector<16x32xf32>
      %202 = vector.shape_cast %201 : vector<16x32xf32> to vector<1x16x32xf32>
      %203 = vector.broadcast %202 : vector<1x16x32xf32> to vector<2x16x32xf32>
      %204 = arith.addf %200, %203 : vector<2x16x32xf32>
      %205 = vector.shape_cast %204 : vector<2x16x32xf32> to vector<32x32xf32>
      %c0_66 = arith.constant 0 : index
      %c0_67 = arith.constant 0 : index
      %206 = vector.load %arg13[%c0_66, %c0_67] : memref<32x32xf32, #tpu.memory_space<vmem>>, vector<32x32xf32>
      tpu.vector_store %arg13[%c0_66, %c0_67], %205 {strides = array<i32>} : memref<32x32xf32, #tpu.memory_space<vmem>>, vector<32x32xf32>,
      %207 = tpu.iota {dimensions = array<i32: 0>} : vector<16x16xi32>
      %208 = tpu.iota {dimensions = array<i32: 1>} : vector<16x16xi32>
      %209 = arith.cmpi sle, %208, %207 : vector<16x16xi32>
      %c10_i32 = arith.constant 10 : i32
      %210 = vector.broadcast %c10_i32 : i32 to vector<16x16xi32>
      %211 = arith.cmpi slt, %208, %210 : vector<16x16xi32>
      %212 = arith.andi %209, %211 : vector<16x16xi1>
      %cst_68 = arith.constant 0.000000e+00 : f32
      %cst_69 = arith.constant -1.000000e+30 : f32
      %213 = vector.broadcast %cst_68 : f32 to vector<16x16xf32>
      %214 = vector.broadcast %cst_69 : f32 to vector<16x16xf32>
      %215 = arith.select %212, %213, %214 : vector<16x16xi1>, vector<16x16xf32>
      %c0_70 = arith.constant 0 : index
      %c0_71 = arith.constant 0 : index
      %216 = vector.load %arg14[%c0_70, %c0_71] : memref<16x16xf32, #tpu.memory_space<vmem>>, vector<16x16xf32>
      tpu.vector_store %arg14[%c0_70, %c0_71], %215 {strides = array<i32>} : memref<16x16xf32, #tpu.memory_space<vmem>>, vector<16x16xf32>,
    } else {
    }
    %c0 = arith.constant 0 : index
    %c0_1 = arith.constant 0 : index
    %c0_2 = arith.constant 0 : index
    %3 = vector.load %arg9[%c0, %c0_1, %c0_2] : memref<1x8x128xf32, #tpu.memory_space<vmem>>, vector<1x8x128xf32>
    %4 = vector.shape_cast %3 : vector<1x8x128xf32> to vector<8x128xf32>
    %5 = vector.extract_strided_slice %4 {offsets = [0, 0], sizes = [1, 32], strides = [1, 1]} : vector<8x128xf32> to vector<1x32xf32>
    %6 = vector.extract_strided_slice %4 {offsets = [1, 0], sizes = [1, 32], strides = [1, 1]} : vector<8x128xf32> to vector<1x32xf32>
    %7 = vector.extract_strided_slice %4 {offsets = [2, 0], sizes = [1, 32], strides = [1, 1]} : vector<8x128xf32> to vector<1x32xf32>
    %8 = vector.extract_strided_slice %4 {offsets = [3, 0], sizes = [1, 32], strides = [1, 1]} : vector<8x128xf32> to vector<1x32xf32>
    %9 = vector.extract_strided_slice %4 {offsets = [4, 0], sizes = [1, 32], strides = [1, 1]} : vector<8x128xf32> to vector<1x32xf32>
    %10 = vector.extract_strided_slice %4 {offsets = [5, 0], sizes = [1, 32], strides = [1, 1]} : vector<8x128xf32> to vector<1x32xf32>
    %11 = vector.extract_strided_slice %4 {offsets = [6, 0], sizes = [1, 128], strides = [1, 1]} : vector<8x128xf32> to vector<1x128xf32>
    %12 = vector.extract_strided_slice %4 {offsets = [7, 0], sizes = [1, 96], strides = [1, 1]} : vector<8x128xf32> to vector<1x96xf32>
    %c0_3 = arith.constant 0 : index
    %c0_4 = arith.constant 0 : index
    %13 = vector.load %arg13[%c0_3, %c0_4] : memref<32x32xf32, #tpu.memory_space<vmem>>, vector<32x32xf32>
    %cst = arith.constant dense<0.000000e+00> : vector<32xf32>
    %14 = vector.multi_reduction <add>, %13, %cst [1] : vector<32x32xf32> to vector<32xf32>
    %15 = vector.shape_cast %14 : vector<32xf32> to vector<32x1xf32>
    %cst_5 = arith.constant 3.200000e+01 : f32
    %16 = vector.broadcast %cst_5 : f32 to vector<32x1xf32>
    %17 = arith.divf %15, %16 : vector<32x1xf32>
    %18 = vector.broadcast %17 : vector<32x1xf32> to vector<32x32xf32>
    %19 = arith.subf %13, %18 : vector<32x32xf32>
    %20 = arith.mulf %19, %19 : vector<32x32xf32>
    %cst_6 = arith.constant dense<0.000000e+00> : vector<32xf32>
    %21 = vector.multi_reduction <add>, %20, %cst_6 [1] : vector<32x32xf32> to vector<32xf32>
    %22 = vector.shape_cast %21 : vector<32xf32> to vector<32x1xf32>
    %cst_7 = arith.constant 3.200000e+01 : f32
    %23 = vector.broadcast %cst_7 : f32 to vector<32x1xf32>
    %24 = arith.divf %22, %23 : vector<32x1xf32>
    %25 = vector.broadcast %17 : vector<32x1xf32> to vector<32x32xf32>
    %26 = arith.subf %13, %25 : vector<32x32xf32>
    %cst_8 = arith.constant 9.99999974E-6 : f32
    %27 = vector.broadcast %cst_8 : f32 to vector<32x1xf32>
    %28 = arith.addf %24, %27 : vector<32x1xf32>
    %29 = math.rsqrt %28 : vector<32x1xf32>
    %30 = vector.broadcast %29 : vector<32x1xf32> to vector<32x32xf32>
    %31 = arith.mulf %26, %30 : vector<32x32xf32>
    %32 = vector.broadcast %5 : vector<1x32xf32> to vector<32x32xf32>
    %33 = arith.mulf %31, %32 : vector<32x32xf32>
    %34 = vector.broadcast %6 : vector<1x32xf32> to vector<32x32xf32>
    %35 = arith.addf %33, %34 : vector<32x32xf32>
    %36 = arith.truncf %35 : vector<32x32xf32> to vector<32x32xbf16>
    %c0_9 = arith.constant 0 : index
    %c0_10 = arith.constant 0 : index
    %c0_11 = arith.constant 0 : index
    %37 = vector.load %arg5[%c0_9, %c0_10, %c0_11] : memref<1x32x96xbf16, #tpu.memory_space<vmem>>, vector<1x32x96xbf16>
    %38 = vector.shape_cast %37 : vector<1x32x96xbf16> to vector<32x96xbf16>
    %cst_12 = arith.constant dense<0.000000e+00> : vector<32x96xf32>
    %39 = tpu.matmul %36, %38, %cst_12 {dimension_numbers = #tpu.dot_dimension_numbers<[1], [0], [0], [1], [0, 0, 1, 1], [], []>} : vector<32x32xbf16>, vector<32x96xbf16>, vector<32x96xf32> -> vector<32x96xf32>
    %40 = vector.broadcast %12 : vector<1x96xf32> to vector<32x96xf32>
    %41 = arith.addf %39, %40 : vector<32x96xf32>
    %42 = vector.extract_strided_slice %41 {offsets = [0, 0], sizes = [32, 32], strides = [1, 1]} : vector<32x96xf32> to vector<32x32xf32>
    %cst_13 = arith.constant 0.353553385 : f32
    %43 = vector.broadcast %cst_13 : f32 to vector<32x32xf32>
    %44 = arith.mulf %42, %43 : vector<32x32xf32>
    %45 = arith.truncf %44 : vector<32x32xf32> to vector<32x32xbf16>
    %46 = vector.extract_strided_slice %41 {offsets = [0, 32], sizes = [32, 32], strides = [1, 1]} : vector<32x96xf32> to vector<32x32xf32>
    %47 = arith.truncf %46 : vector<32x32xf32> to vector<32x32xbf16>
    %48 = vector.extract_strided_slice %41 {offsets = [0, 64], sizes = [32, 32], strides = [1, 1]} : vector<32x96xf32> to vector<32x32xf32>
    %49 = arith.truncf %48 : vector<32x32xf32> to vector<32x32xbf16>
    %c0_14 = arith.constant 0 : index
    %c0_15 = arith.constant 0 : index
    %50 = vector.load %arg14[%c0_14, %c0_15] : memref<16x16xf32, #tpu.memory_space<vmem>>, vector<16x16xf32>
    %51 = vector.shape_cast %50 : vector<16x16xf32> to vector<1x16x16xf32>
    %52 = vector.shape_cast %51 : vector<1x16x16xf32> to vector<1x16x16xf32>
    %53 = vector.broadcast %52 : vector<1x16x16xf32> to vector<2x16x16xf32>
    %54 = vector.extract_strided_slice %45 {offsets = [0, 0], sizes = [32, 8], strides = [1, 1]} : vector<32x32xbf16> to vector<32x8xbf16>
    %55 = vector.shape_cast %54 : vector<32x8xbf16> to vector<2x16x8xbf16>
    %56 = vector.extract_strided_slice %47 {offsets = [0, 0], sizes = [32, 8], strides = [1, 1]} : vector<32x32xbf16> to vector<32x8xbf16>
    %57 = vector.shape_cast %56 : vector<32x8xbf16> to vector<2x16x8xbf16>
    %58 = vector.extract_strided_slice %49 {offsets = [0, 0], sizes = [32, 8], strides = [1, 1]} : vector<32x32xbf16> to vector<32x8xbf16>
    %59 = vector.shape_cast %58 : vector<32x8xbf16> to vector<2x16x8xbf16>
    "tpu.trace_start"() <{level = 10 : i32, message = "bqd,bkd->bqk"}> : () -> ()
    %cst_16 = arith.constant dense<0.000000e+00> : vector<2x16x16xf32>
    %60 = tpu.matmul %55, %57, %cst_16 {dimension_numbers = #tpu.dot_dimension_numbers<[2], [2], [1], [1], [0, 0, 0, 1, 1, 1], [0], [0]>} : vector<2x16x8xbf16>, vector<2x16x8xbf16>, vector<2x16x16xf32> -> vector<2x16x16xf32>
    "tpu.trace_stop"() : () -> ()
    %61 = arith.addf %60, %53 : vector<2x16x16xf32>
    %cst_17 = arith.constant dense<0xFF800000> : vector<2x16xf32>
    %62 = vector.multi_reduction <maximumf>, %61, %cst_17 [2] : vector<2x16x16xf32> to vector<2x16xf32>
    %63 = vector.shape_cast %62 : vector<2x16xf32> to vector<2x16x1xf32>
    %64 = vector.broadcast %63 : vector<2x16x1xf32> to vector<2x16x16xf32>
    %65 = arith.subf %61, %64 : vector<2x16x16xf32>
    %66 = math.exp %65 : vector<2x16x16xf32>
    %cst_18 = arith.constant dense<0.000000e+00> : vector<2x16xf32>
    %67 = vector.multi_reduction <add>, %66, %cst_18 [2] : vector<2x16x16xf32> to vector<2x16xf32>
    %68 = vector.shape_cast %67 : vector<2x16xf32> to vector<2x16x1xf32>
    %69 = tpu.reciprocal %68 {approx = true} : vector<2x16x1xf32> -> vector<2x16x1xf32>
    %70 = vector.broadcast %69 : vector<2x16x1xf32> to vector<2x16x16xf32>
    %71 = arith.mulf %66, %70 : vector<2x16x16xf32>
    %72 = arith.truncf %71 : vector<2x16x16xf32> to vector<2x16x16xbf16>
    "tpu.trace_start"() <{level = 10 : i32, message = "bqk,bkd->bqd"}> : () -> ()
    %cst_19 = arith.constant dense<0.000000e+00> : vector<2x16x8xf32>
    %73 = tpu.matmul %72, %59, %cst_19 {dimension_numbers = #tpu.dot_dimension_numbers<[2], [1], [1], [2], [0, 0, 0, 1, 1, 2], [0], [0]>} : vector<2x16x16xbf16>, vector<2x16x8xbf16>, vector<2x16x8xf32> -> vector<2x16x8xf32>
    "tpu.trace_stop"() : () -> ()
    %74 = vector.shape_cast %73 : vector<2x16x8xf32> to vector<32x8xf32>
    %75 = arith.truncf %74 : vector<32x8xf32> to vector<32x8xbf16>
    %c0_20 = arith.constant 0 : index
    %c0_21 = arith.constant 0 : index
    %76 = vector.load %arg15[%c0_20, %c0_21] : memref<32x32xbf16, #tpu.memory_space<vmem>>, vector<32x8xbf16>
    tpu.vector_store %arg15[%c0_20, %c0_21], %75 {strides = array<i32>} : memref<32x32xbf16, #tpu.memory_space<vmem>>, vector<32x8xbf16>,
    %77 = vector.extract_strided_slice %45 {offsets = [0, 8], sizes = [32, 8], strides = [1, 1]} : vector<32x32xbf16> to vector<32x8xbf16>
    %78 = vector.shape_cast %77 : vector<32x8xbf16> to vector<2x16x8xbf16>
    %79 = vector.extract_strided_slice %47 {offsets = [0, 8], sizes = [32, 8], strides = [1, 1]} : vector<32x32xbf16> to vector<32x8xbf16>
    %80 = vector.shape_cast %79 : vector<32x8xbf16> to vector<2x16x8xbf16>
    %81 = vector.extract_strided_slice %49 {offsets = [0, 8], sizes = [32, 8], strides = [1, 1]} : vector<32x32xbf16> to vector<32x8xbf16>
    %82 = vector.shape_cast %81 : vector<32x8xbf16> to vector<2x16x8xbf16>
    "tpu.trace_start"() <{level = 10 : i32, message = "bqd,bkd->bqk"}> : () -> ()
    %cst_22 = arith.constant dense<0.000000e+00> : vector<2x16x16xf32>
    %83 = tpu.matmul %78, %80, %cst_22 {dimension_numbers = #tpu.dot_dimension_numbers<[2], [2], [1], [1], [0, 0, 0, 1, 1, 1], [0], [0]>} : vector<2x16x8xbf16>, vector<2x16x8xbf16>, vector<2x16x16xf32> -> vector<2x16x16xf32>
    "tpu.trace_stop"() : () -> ()
    %84 = arith.addf %83, %53 : vector<2x16x16xf32>
    %cst_23 = arith.constant dense<0xFF800000> : vector<2x16xf32>
    %85 = vector.multi_reduction <maximumf>, %84, %cst_23 [2] : vector<2x16x16xf32> to vector<2x16xf32>
    %86 = vector.shape_cast %85 : vector<2x16xf32> to vector<2x16x1xf32>
    %87 = vector.broadcast %86 : vector<2x16x1xf32> to vector<2x16x16xf32>
    %88 = arith.subf %84, %87 : vector<2x16x16xf32>
    %89 = math.exp %88 : vector<2x16x16xf32>
    %cst_24 = arith.constant dense<0.000000e+00> : vector<2x16xf32>
    %90 = vector.multi_reduction <add>, %89, %cst_24 [2] : vector<2x16x16xf32> to vector<2x16xf32>
    %91 = vector.shape_cast %90 : vector<2x16xf32> to vector<2x16x1xf32>
    %92 = tpu.reciprocal %91 {approx = true} : vector<2x16x1xf32> -> vector<2x16x1xf32>
    %93 = vector.broadcast %92 : vector<2x16x1xf32> to vector<2x16x16xf32>
    %94 = arith.mulf %89, %93 : vector<2x16x16xf32>
    %95 = arith.truncf %94 : vector<2x16x16xf32> to vector<2x16x16xbf16>
    "tpu.trace_start"() <{level = 10 : i32, message = "bqk,bkd->bqd"}> : () -> ()
    %cst_25 = arith.constant dense<0.000000e+00> : vector<2x16x8xf32>
    %96 = tpu.matmul %95, %82, %cst_25 {dimension_numbers = #tpu.dot_dimension_numbers<[2], [1], [1], [2], [0, 0, 0, 1, 1, 2], [0], [0]>} : vector<2x16x16xbf16>, vector<2x16x8xbf16>, vector<2x16x8xf32> -> vector<2x16x8xf32>
    "tpu.trace_stop"() : () -> ()
    %97 = vector.shape_cast %96 : vector<2x16x8xf32> to vector<32x8xf32>
    %98 = arith.truncf %97 : vector<32x8xf32> to vector<32x8xbf16>
    %c0_26 = arith.constant 0 : index
    %c8 = arith.constant 8 : index
    %99 = vector.load %arg15[%c0_26, %c8] : memref<32x32xbf16, #tpu.memory_space<vmem>>, vector<32x8xbf16>
    tpu.vector_store %arg15[%c0_26, %c8], %98 {strides = array<i32>} : memref<32x32xbf16, #tpu.memory_space<vmem>>, vector<32x8xbf16>,
    %100 = vector.extract_strided_slice %45 {offsets = [0, 16], sizes = [32, 8], strides = [1, 1]} : vector<32x32xbf16> to vector<32x8xbf16>
    %101 = vector.shape_cast %100 : vector<32x8xbf16> to vector<2x16x8xbf16>
    %102 = vector.extract_strided_slice %47 {offsets = [0, 16], sizes = [32, 8], strides = [1, 1]} : vector<32x32xbf16> to vector<32x8xbf16>
    %103 = vector.shape_cast %102 : vector<32x8xbf16> to vector<2x16x8xbf16>
    %104 = vector.extract_strided_slice %49 {offsets = [0, 16], sizes = [32, 8], strides = [1, 1]} : vector<32x32xbf16> to vector<32x8xbf16>
    %105 = vector.shape_cast %104 : vector<32x8xbf16> to vector<2x16x8xbf16>
    "tpu.trace_start"() <{level = 10 : i32, message = "bqd,bkd->bqk"}> : () -> ()
    %cst_27 = arith.constant dense<0.000000e+00> : vector<2x16x16xf32>
    %106 = tpu.matmul %101, %103, %cst_27 {dimension_numbers = #tpu.dot_dimension_numbers<[2], [2], [1], [1], [0, 0, 0, 1, 1, 1], [0], [0]>} : vector<2x16x8xbf16>, vector<2x16x8xbf16>, vector<2x16x16xf32> -> vector<2x16x16xf32>
    "tpu.trace_stop"() : () -> ()
    %107 = arith.addf %106, %53 : vector<2x16x16xf32>
    %cst_28 = arith.constant dense<0xFF800000> : vector<2x16xf32>
    %108 = vector.multi_reduction <maximumf>, %107, %cst_28 [2] : vector<2x16x16xf32> to vector<2x16xf32>
    %109 = vector.shape_cast %108 : vector<2x16xf32> to vector<2x16x1xf32>
    %110 = vector.broadcast %109 : vector<2x16x1xf32> to vector<2x16x16xf32>
    %111 = arith.subf %107, %110 : vector<2x16x16xf32>
    %112 = math.exp %111 : vector<2x16x16xf32>
    %cst_29 = arith.constant dense<0.000000e+00> : vector<2x16xf32>
    %113 = vector.multi_reduction <add>, %112, %cst_29 [2] : vector<2x16x16xf32> to vector<2x16xf32>
    %114 = vector.shape_cast %113 : vector<2x16xf32> to vector<2x16x1xf32>
    %115 = tpu.reciprocal %114 {approx = true} : vector<2x16x1xf32> -> vector<2x16x1xf32>
    %116 = vector.broadcast %115 : vector<2x16x1xf32> to vector<2x16x16xf32>
    %117 = arith.mulf %112, %116 : vector<2x16x16xf32>
    %118 = arith.truncf %117 : vector<2x16x16xf32> to vector<2x16x16xbf16>
    "tpu.trace_start"() <{level = 10 : i32, message = "bqk,bkd->bqd"}> : () -> ()
    %cst_30 = arith.constant dense<0.000000e+00> : vector<2x16x8xf32>
    %119 = tpu.matmul %118, %105, %cst_30 {dimension_numbers = #tpu.dot_dimension_numbers<[2], [1], [1], [2], [0, 0, 0, 1, 1, 2], [0], [0]>} : vector<2x16x16xbf16>, vector<2x16x8xbf16>, vector<2x16x8xf32> -> vector<2x16x8xf32>
    "tpu.trace_stop"() : () -> ()
    %120 = vector.shape_cast %119 : vector<2x16x8xf32> to vector<32x8xf32>
    %121 = arith.truncf %120 : vector<32x8xf32> to vector<32x8xbf16>
    %c0_31 = arith.constant 0 : index
    %c16 = arith.constant 16 : index
    %122 = vector.load %arg15[%c0_31, %c16] : memref<32x32xbf16, #tpu.memory_space<vmem>>, vector<32x8xbf16>
    tpu.vector_store %arg15[%c0_31, %c16], %121 {strides = array<i32>} : memref<32x32xbf16, #tpu.memory_space<vmem>>, vector<32x8xbf16>,
    %123 = vector.extract_strided_slice %45 {offsets = [0, 24], sizes = [32, 8], strides = [1, 1]} : vector<32x32xbf16> to vector<32x8xbf16>
    %124 = vector.shape_cast %123 : vector<32x8xbf16> to vector<2x16x8xbf16>
    %125 = vector.extract_strided_slice %47 {offsets = [0, 24], sizes = [32, 8], strides = [1, 1]} : vector<32x32xbf16> to vector<32x8xbf16>
    %126 = vector.shape_cast %125 : vector<32x8xbf16> to vector<2x16x8xbf16>
    %127 = vector.extract_strided_slice %49 {offsets = [0, 24], sizes = [32, 8], strides = [1, 1]} : vector<32x32xbf16> to vector<32x8xbf16>
    %128 = vector.shape_cast %127 : vector<32x8xbf16> to vector<2x16x8xbf16>
    "tpu.trace_start"() <{level = 10 : i32, message = "bqd,bkd->bqk"}> : () -> ()
    %cst_32 = arith.constant dense<0.000000e+00> : vector<2x16x16xf32>
    %129 = tpu.matmul %124, %126, %cst_32 {dimension_numbers = #tpu.dot_dimension_numbers<[2], [2], [1], [1], [0, 0, 0, 1, 1, 1], [0], [0]>} : vector<2x16x8xbf16>, vector<2x16x8xbf16>, vector<2x16x16xf32> -> vector<2x16x16xf32>
    "tpu.trace_stop"() : () -> ()
    %130 = arith.addf %129, %53 : vector<2x16x16xf32>
    %cst_33 = arith.constant dense<0xFF800000> : vector<2x16xf32>
    %131 = vector.multi_reduction <maximumf>, %130, %cst_33 [2] : vector<2x16x16xf32> to vector<2x16xf32>
    %132 = vector.shape_cast %131 : vector<2x16xf32> to vector<2x16x1xf32>
    %133 = vector.broadcast %132 : vector<2x16x1xf32> to vector<2x16x16xf32>
    %134 = arith.subf %130, %133 : vector<2x16x16xf32>
    %135 = math.exp %134 : vector<2x16x16xf32>
    %cst_34 = arith.constant dense<0.000000e+00> : vector<2x16xf32>
    %136 = vector.multi_reduction <add>, %135, %cst_34 [2] : vector<2x16x16xf32> to vector<2x16xf32>
    %137 = vector.shape_cast %136 : vector<2x16xf32> to vector<2x16x1xf32>
    %138 = tpu.reciprocal %137 {approx = true} : vector<2x16x1xf32> -> vector<2x16x1xf32>
    %139 = vector.broadcast %138 : vector<2x16x1xf32> to vector<2x16x16xf32>
    %140 = arith.mulf %135, %139 : vector<2x16x16xf32>
    %141 = arith.truncf %140 : vector<2x16x16xf32> to vector<2x16x16xbf16>
    "tpu.trace_start"() <{level = 10 : i32, message = "bqk,bkd->bqd"}> : () -> ()
    %cst_35 = arith.constant dense<0.000000e+00> : vector<2x16x8xf32>
    %142 = tpu.matmul %141, %128, %cst_35 {dimension_numbers = #tpu.dot_dimension_numbers<[2], [1], [1], [2], [0, 0, 0, 1, 1, 2], [0], [0]>} : vector<2x16x16xbf16>, vector<2x16x8xbf16>, vector<2x16x8xf32> -> vector<2x16x8xf32>
    "tpu.trace_stop"() : () -> ()
    %143 = vector.shape_cast %142 : vector<2x16x8xf32> to vector<32x8xf32>
    %144 = arith.truncf %143 : vector<32x8xf32> to vector<32x8xbf16>
    %c0_36 = arith.constant 0 : index
    %c24 = arith.constant 24 : index
    %145 = vector.load %arg15[%c0_36, %c24] : memref<32x32xbf16, #tpu.memory_space<vmem>>, vector<32x8xbf16>
    tpu.vector_store %arg15[%c0_36, %c24], %144 {strides = array<i32>} : memref<32x32xbf16, #tpu.memory_space<vmem>>, vector<32x8xbf16>,
    %c0_37 = arith.constant 0 : index
    %c0_38 = arith.constant 0 : index
    %146 = vector.load %arg15[%c0_37, %c0_38] : memref<32x32xbf16, #tpu.memory_space<vmem>>, vector<32x32xbf16>
    %c0_39 = arith.constant 0 : index
    %c0_40 = arith.constant 0 : index
    %c0_41 = arith.constant 0 : index
    %147 = vector.load %arg6[%c0_39, %c0_40, %c0_41] : memref<1x32x32xbf16, #tpu.memory_space<vmem>>, vector<1x32x32xbf16>
    %148 = vector.shape_cast %147 : vector<1x32x32xbf16> to vector<32x32xbf16>
    %cst_42 = arith.constant dense<0.000000e+00> : vector<32x32xf32>
    %149 = tpu.matmul %146, %148, %cst_42 {dimension_numbers = #tpu.dot_dimension_numbers<[1], [0], [0], [1], [0, 0, 1, 1], [], []>} : vector<32x32xbf16>, vector<32x32xbf16>, vector<32x32xf32> -> vector<32x32xf32>
    %150 = arith.addf %13, %149 : vector<32x32xf32>
    %151 = vector.broadcast %9 : vector<1x32xf32> to vector<32x32xf32>
    %152 = arith.addf %150, %151 : vector<32x32xf32>
    %cst_43 = arith.constant dense<0.000000e+00> : vector<32xf32>
    %153 = vector.multi_reduction <add>, %152, %cst_43 [1] : vector<32x32xf32> to vector<32xf32>
    %154 = vector.shape_cast %153 : vector<32xf32> to vector<32x1xf32>
    %cst_44 = arith.constant 3.200000e+01 : f32
    %155 = vector.broadcast %cst_44 : f32 to vector<32x1xf32>
    %156 = arith.divf %154, %155 : vector<32x1xf32>
    %157 = vector.broadcast %156 : vector<32x1xf32> to vector<32x32xf32>
    %158 = arith.subf %152, %157 : vector<32x32xf32>
    %159 = arith.mulf %158, %158 : vector<32x32xf32>
    %cst_45 = arith.constant dense<0.000000e+00> : vector<32xf32>
    %160 = vector.multi_reduction <add>, %159, %cst_45 [1] : vector<32x32xf32> to vector<32xf32>
    %161 = vector.shape_cast %160 : vector<32xf32> to vector<32x1xf32>
    %cst_46 = arith.constant 3.200000e+01 : f32
    %162 = vector.broadcast %cst_46 : f32 to vector<32x1xf32>
    %163 = arith.divf %161, %162 : vector<32x1xf32>
    %164 = vector.broadcast %156 : vector<32x1xf32> to vector<32x32xf32>
    %165 = arith.subf %152, %164 : vector<32x32xf32>
    %cst_47 = arith.constant 9.99999974E-6 : f32
    %166 = vector.broadcast %cst_47 : f32 to vector<32x1xf32>
    %167 = arith.addf %163, %166 : vector<32x1xf32>
    %168 = math.rsqrt %167 : vector<32x1xf32>
    %169 = vector.broadcast %168 : vector<32x1xf32> to vector<32x32xf32>
    %170 = arith.mulf %165, %169 : vector<32x32xf32>
    %171 = vector.broadcast %7 : vector<1x32xf32> to vector<32x32xf32>
    %172 = arith.mulf %170, %171 : vector<32x32xf32>
    %173 = vector.broadcast %8 : vector<1x32xf32> to vector<32x32xf32>
    %174 = arith.addf %172, %173 : vector<32x32xf32>
    %175 = arith.truncf %174 : vector<32x32xf32> to vector<32x32xbf16>
    %c0_48 = arith.constant 0 : index
    %c0_49 = arith.constant 0 : index
    %c0_50 = arith.constant 0 : index
    %176 = vector.load %arg7[%c0_48, %c0_49, %c0_50] : memref<1x32x128xbf16, #tpu.memory_space<vmem>>, vector<1x32x128xbf16>
    %177 = vector.shape_cast %176 : vector<1x32x128xbf16> to vector<32x128xbf16>
    %cst_51 = arith.constant dense<0.000000e+00> : vector<32x128xf32>
    %178 = tpu.matmul %175, %177, %cst_51 {dimension_numbers = #tpu.dot_dimension_numbers<[1], [0], [0], [1], [0, 0, 1, 1], [], []>} : vector<32x32xbf16>, vector<32x128xbf16>, vector<32x128xf32> -> vector<32x128xf32>
    %179 = vector.broadcast %11 : vector<1x128xf32> to vector<32x128xf32>
    %180 = arith.addf %178, %179 : vector<32x128xf32>
    %181 = arith.truncf %180 : vector<32x128xf32> to vector<32x128xbf16>
    %cst_52 = arith.constant 1.703130e+00 : bf16
    %182 = vector.broadcast %cst_52 : bf16 to vector<32x128xbf16>
    %183 = arith.mulf %182, %181 : vector<32x128xbf16>
    %184 = arith.negf %183 : vector<32x128xbf16>
    %185 = math.exp %184 : vector<32x128xbf16>
    %cst_53 = arith.constant 1.000000e+00 : bf16
    %186 = vector.broadcast %cst_53 : bf16 to vector<32x128xbf16>
    %187 = arith.addf %186, %185 : vector<32x128xbf16>
    %188 = arith.divf %186, %187 : vector<32x128xbf16>
    %189 = arith.mulf %181, %188 : vector<32x128xbf16>
    %c0_54 = arith.constant 0 : index
    %c0_55 = arith.constant 0 : index
    %c0_56 = arith.constant 0 : index
    %190 = vector.load %arg8[%c0_54, %c0_55, %c0_56] : memref<1x128x32xbf16, #tpu.memory_space<vmem>>, vector<1x128x32xbf16>
    %191 = vector.shape_cast %190 : vector<1x128x32xbf16> to vector<128x32xbf16>
    %cst_57 = arith.constant dense<0.000000e+00> : vector<32x32xf32>
    %192 = tpu.matmul %189, %191, %cst_57 {dimension_numbers = #tpu.dot_dimension_numbers<[1], [0], [0], [1], [0, 0, 1, 1], [], []>} : vector<32x128xbf16>, vector<128x32xbf16>, vector<32x32xf32> -> vector<32x32xf32>
    %193 = vector.broadcast %10 : vector<1x32xf32> to vector<32x32xf32>
    %194 = arith.addf %192, %193 : vector<32x32xf32>
    %195 = arith.addf %152, %194 : vector<32x32xf32>
    %c0_58 = arith.constant 0 : index
    %c0_59 = arith.constant 0 : index
    %196 = vector.load %arg13[%c0_58, %c0_59] : memref<32x32xf32, #tpu.memory_space<vmem>>, vector<32x32xf32>
    tpu.vector_store %arg13[%c0_58, %c0_59], %195 {strides = array<i32>} : memref<32x32xf32, #tpu.memory_space<vmem>>, vector<32x32xf32>,
    %c1_i32 = arith.constant 1 : i32
    %197 = arith.cmpi eq, %arg1, %c1_i32 : i32
    %198 = arith.extui %197 : i1 to i32
    %c0_i32_60 = arith.constant 0 : i32
    %199 = arith.cmpi ne, %198, %c0_i32_60 : i32
    scf.if %199 {
      %c2_i32 = arith.constant 2 : i32
      %200 = arith.muli %arg0, %c2_i32 : i32
      %c0_i32_61 = arith.constant 0 : i32
      %201 = arith.addi %200, %c0_i32_61 : i32
      %202 = arith.index_cast %201 : i32 to index
      %203 = memref.load %arg2[%202] : memref<2xi32, #tpu.memory_space<smem>>
      %c0_i32_62 = arith.constant 0 : i32
      %204 = arith.addi %c0_i32_62, %203 : i32
      %205 = arith.index_cast %204 : i32 to index
      %c0_63 = arith.constant 0 : index
      %206 = vector.load %arg13[%205, %c0_63] : memref<32x32xf32, #tpu.memory_space<vmem>>, vector<1x32xf32>
      %c0_64 = arith.constant 0 : index
      %c0_65 = arith.constant 0 : index
      %207 = vector.load %arg16[%c0_64, %c0_65] : memref<2x32xf32, #tpu.memory_space<vmem>>, vector<1x32xf32>
      tpu.vector_store %arg16[%c0_64, %c0_65], %206 {strides = array<i32>} : memref<2x32xf32, #tpu.memory_space<vmem>>, vector<1x32xf32>,
      %c2_i32_66 = arith.constant 2 : i32
      %208 = arith.muli %arg0, %c2_i32_66 : i32
      %c1_i32_67 = arith.constant 1 : i32
      %209 = arith.addi %208, %c1_i32_67 : i32
      %210 = arith.index_cast %209 : i32 to index
      %211 = memref.load %arg2[%210] : memref<2xi32, #tpu.memory_space<smem>>
      %c16_i32 = arith.constant 16 : i32
      %212 = arith.addi %c16_i32, %211 : i32
      %213 = arith.index_cast %212 : i32 to index
      %c0_68 = arith.constant 0 : index
      %214 = vector.load %arg13[%213, %c0_68] : memref<32x32xf32, #tpu.memory_space<vmem>>, vector<1x32xf32>
      %c1 = arith.constant 1 : index
      %c0_69 = arith.constant 0 : index
      %215 = vector.load %arg16[%c1, %c0_69] : memref<2x32xf32, #tpu.memory_space<vmem>>, vector<1x32xf32>
      tpu.vector_store %arg16[%c1, %c0_69], %214 {strides = array<i32>} : memref<2x32xf32, #tpu.memory_space<vmem>>, vector<1x32xf32>,
      %c0_70 = arith.constant 0 : index
      %c0_71 = arith.constant 0 : index
      %216 = vector.load %arg16[%c0_70, %c0_71] : memref<2x32xf32, #tpu.memory_space<vmem>>, vector<2x32xf32>
      %c0_72 = arith.constant 0 : index
      %c0_73 = arith.constant 0 : index
      %217 = vector.load %arg10[%c0_72, %c0_73] : memref<2x32xf32, #tpu.memory_space<vmem>>, vector<1x32xf32>
      %c1_74 = arith.constant 1 : index
      %c0_75 = arith.constant 0 : index
      %218 = vector.load %arg10[%c1_74, %c0_75] : memref<2x32xf32, #tpu.memory_space<vmem>>, vector<1x32xf32>
      %cst_76 = arith.constant dense<0.000000e+00> : vector<2xf32>
      %219 = vector.multi_reduction <add>, %216, %cst_76 [1] : vector<2x32xf32> to vector<2xf32>
      %220 = vector.shape_cast %219 : vector<2xf32> to vector<2x1xf32>
      %cst_77 = arith.constant 3.200000e+01 : f32
      %221 = vector.broadcast %cst_77 : f32 to vector<2x1xf32>
      %222 = arith.divf %220, %221 : vector<2x1xf32>
      %223 = vector.broadcast %222 : vector<2x1xf32> to vector<2x32xf32>
      %224 = arith.subf %216, %223 : vector<2x32xf32>
      %225 = arith.mulf %224, %224 : vector<2x32xf32>
      %cst_78 = arith.constant dense<0.000000e+00> : vector<2xf32>
      %226 = vector.multi_reduction <add>, %225, %cst_78 [1] : vector<2x32xf32> to vector<2xf32>
      %227 = vector.shape_cast %226 : vector<2xf32> to vector<2x1xf32>
      %cst_79 = arith.constant 3.200000e+01 : f32
      %228 = vector.broadcast %cst_79 : f32 to vector<2x1xf32>
      %229 = arith.divf %227, %228 : vector<2x1xf32>
      %230 = vector.broadcast %222 : vector<2x1xf32> to vector<2x32xf32>
      %231 = arith.subf %216, %230 : vector<2x32xf32>
      %cst_80 = arith.constant 9.99999974E-6 : f32
      %232 = vector.broadcast %cst_80 : f32 to vector<2x1xf32>
      %233 = arith.addf %229, %232 : vector<2x1xf32>
      %234 = math.rsqrt %233 : vector<2x1xf32>
      %235 = vector.broadcast %234 : vector<2x1xf32> to vector<2x32xf32>
      %236 = arith.mulf %231, %235 : vector<2x32xf32>
      %237 = vector.broadcast %217 : vector<1x32xf32> to vector<2x32xf32>
      %238 = arith.mulf %236, %237 : vector<2x32xf32>
      %239 = vector.broadcast %218 : vector<1x32xf32> to vector<2x32xf32>
      %240 = arith.addf %238, %239 : vector<2x32xf32>
      %241 = arith.truncf %240 : vector<2x32xf32> to vector<2x32xbf16>
      %c0_81 = arith.constant 0 : index
      %c0_82 = arith.constant 0 : index
      %242 = vector.load %arg11[%c0_81, %c0_82] : memref<32x32xbf16, #tpu.memory_space<vmem>>, vector<32x32xbf16>
      %cst_83 = arith.constant dense<0.000000e+00> : vector<2x32xf32>
      %243 = tpu.matmul %241, %242, %cst_83 {dimension_numbers = #tpu.dot_dimension_numbers<[1], [0], [0], [1], [0, 0, 1, 1], [], []>} : vector<2x32xbf16>, vector<32x32xbf16>, vector<2x32xf32> -> vector<2x32xf32>
      %c0_84 = arith.constant 0 : index
      %c0_85 = arith.constant 0 : index
      %244 = vector.load %arg12[%c0_84, %c0_85] : memref<2x32xf32, #tpu.memory_space<vmem>>, vector<2x32xf32>
      tpu.vector_store %arg12[%c0_84, %c0_85], %243 {strides = array<i32>} : memref<2x32xf32, #tpu.memory_space<vmem>>, vector<2x32xf32>,
    } else {
    }
    return
  }
  func.func @transform_0(%arg0: i32, %arg1: i32, %arg2: memref<2xi32, #tpu.memory_space<smem>>) -> (i32, i32, i32) {
    %c0_i32 = arith.constant 0 : i32
    %c0_i32_0 = arith.constant 0 : i32
    %c0_i32_1 = arith.constant 0 : i32
    return %arg0, %c0_i32, %c0_i32_0 : i32, i32, i32
  }
  func.func @transform_1(%arg0: i32, %arg1: i32, %arg2: memref<2xi32, #tpu.memory_space<smem>>) -> (i32, i32) {
    %c0_i32 = arith.constant 0 : i32
    %c0_i32_0 = arith.constant 0 : i32
    %c0_i32_1 = arith.constant 0 : i32
    return %c0_i32, %c0_i32_0 : i32, i32
  }
  func.func @transform_2(%arg0: i32, %arg1: i32, %arg2: memref<2xi32, #tpu.memory_space<smem>>) -> (i32, i32, i32) {
    %c0_i32 = arith.constant 0 : i32
    %c0_i32_0 = arith.constant 0 : i32
    %c0_i32_1 = arith.constant 0 : i32
    return %arg1, %c0_i32, %c0_i32_0 : i32, i32, i32
  }
  func.func @transform_3(%arg0: i32, %arg1: i32, %arg2: memref<2xi32, #tpu.memory_space<smem>>) -> (i32, i32, i32) {
    %c0_i32 = arith.constant 0 : i32
    %c0_i32_0 = arith.constant 0 : i32
    %c0_i32_1 = arith.constant 0 : i32
    return %arg1, %c0_i32, %c0_i32_0 : i32, i32, i32
  }
  func.func @transform_4(%arg0: i32, %arg1: i32, %arg2: memref<2xi32, #tpu.memory_space<smem>>) -> (i32, i32, i32) {
    %c0_i32 = arith.constant 0 : i32
    %c0_i32_0 = arith.constant 0 : i32
    %c0_i32_1 = arith.constant 0 : i32
    return %arg1, %c0_i32, %c0_i32_0 : i32, i32, i32
  }
  func.func @transform_5(%arg0: i32, %arg1: i32, %arg2: memref<2xi32, #tpu.memory_space<smem>>) -> (i32, i32, i32) {
    %c0_i32 = arith.constant 0 : i32
    %c0_i32_0 = arith.constant 0 : i32
    %c0_i32_1 = arith.constant 0 : i32
    return %arg1, %c0_i32, %c0_i32_0 : i32, i32, i32
  }
  func.func @transform_6(%arg0: i32, %arg1: i32, %arg2: memref<2xi32, #tpu.memory_space<smem>>) -> (i32, i32, i32) {
    %c0_i32 = arith.constant 0 : i32
    %c0_i32_0 = arith.constant 0 : i32
    %c0_i32_1 = arith.constant 0 : i32
    return %arg1, %c0_i32, %c0_i32_0 : i32, i32, i32
  }
  func.func @transform_7(%arg0: i32, %arg1: i32, %arg2: memref<2xi32, #tpu.memory_space<smem>>) -> (i32, i32) {
    %c0_i32 = arith.constant 0 : i32
    %c0_i32_0 = arith.constant 0 : i32
    %c0_i32_1 = arith.constant 0 : i32
    return %c0_i32, %c0_i32_0 : i32, i32
  }
  func.func @transform_8(%arg0: i32, %arg1: i32, %arg2: memref<2xi32, #tpu.memory_space<smem>>) -> (i32, i32) {
    %c0_i32 = arith.constant 0 : i32
    %c0_i32_0 = arith.constant 0 : i32
    %c0_i32_1 = arith.constant 0 : i32
    return %c0_i32, %c0_i32_0 : i32, i32
  }
  func.func @transform_9(%arg0: i32, %arg1: i32, %arg2: memref<2xi32, #tpu.memory_space<smem>>) -> (i32, i32) {
    %c0_i32 = arith.constant 0 : i32
    %c0_i32_0 = arith.constant 0 : i32
    return %arg0, %c0_i32 : i32, i32
  }
}

</mosaic_0001>

<bundles_post_ra>
// kernel: tpu_custom_call.1
= control target key start
LH: loop header
LB: loop body
LE: loop exit
PB: predicated region body
PF: predicated region fallthrough
CT: control target
= control target key end

     0   :  { %s3228_s0 = inlined_call_operand.hbm [shape: s32[2], index: 0, kind: input, shape index: {}]   ;;  %s3229_s1 = inlined_call_operand.vmem [shape: f32[2,16,32], index: 1, kind: input, shape index: {}]   ;;  %s3230_s2 = inlined_call_operand.vmem [shape: f32[16,32], index: 2, kind: input, shape index: {}]   ;;  %s3231_s3 = inlined_call_operand.vmem [shape: bf16[2,32,96], index: 3, kind: input, shape index: {}]   ;;  %s3232_s4 = inlined_call_operand.vmem [shape: bf16[2,32,32], index: 4, kind: input, shape index: {}]   ;;  %s3233_s5 = inlined_call_operand.vmem [shape: bf16[2,32,128], index: 5, kind: input, shape index: {}]   ;;  %s3234_s6 = inlined_call_operand.vmem [shape: bf16[2,128,32], index: 6, kind: input, shape index: {}]   ;;  %s3235_s7 = inlined_call_operand.vmem [shape: f32[2,8,128], index: 7, kind: input, shape index: {}]   ;;  %s3236_s8 = inlined_call_operand.vmem [shape: f32[2,32], index: 8, kind: input, shape index: {}]   ;;  %s3237_s9 = inlined_call_operand.vmem [shape: bf16[32,32], index: 9, kind: input, shape index: {}]   ;;  %s3238_s10 = inlined_call_operand.hbm [shape: f32[2,32], index: 10, kind: output, shape index: {}]  }
   0x1   :  { %s2695_s15 = scalar_lea.hbm %s3228_s0, 16 }
   0x2   :  { %p2696_p0 = scmp.ne.s32.totalorder %s3228_s0, %s2695_s15  ;;  %p2699_p1 = scmp.lt.u32.totalorder %s2695_s15, %s3228_s0 }
   0x4   :  { %p2701_p2 = pnand %p2699_p1, %p2696_p0 }
   0x6   :  { %2704 = shalt.err (!%p2701_p2)  }
   0x7   :  { %s2761_s20 = smov [#allocation7]  }
   0x8   :  { %16 = dma.hbm_to_smem %s3228_s0, 16, %s2761_s20, [#allocation6] }
   0x9   :  { %2743 = dma.done.wait [#allocation6], 16 }
   0xa   :  { %2744 = vsyncadd [#allocation6], 4294967280 }
   0xb   :  { %18 = sfence }
   0xc   :  { %19 = vsyncpa [#allocation9], 0  ;;  %s2849_s23 = smov 0   ;;  %s2851_s24 = smov 0  }
   0xd   :  { %s2853_s25 = smov 0  }
   0xe LB: > { %s34_s26 = sadd.s32 1, %s2755_s24  ;;  %p2263_p4 = scmp.ge.s32.totalorder %s2759_s25, 1  ;;  %s2759_s25 = sphi %s2853_s25, %s25_s25   ;;  %s2755_s24 = sphi %s2851_s24, %s3242_s24   ;;  %s2751_s23 = sphi %s2849_s23, %s3241_s23  }
   0xf   : > { %p35_p3 = scmp.ge.s32.totalorder %s34_s26, 2  ;;  %p356_p5 = scmp.lt.s32.totalorder %s2759_s25, 3 }
  0x11   : > { %s3244_s26 = smov (%p35_p3, %s34_s26), 0  ;;  %p357_p6 = pnand %p2263_p4, %p356_p5 }
  0x12   : > { %p419_p7 = scmp.lt.s32.totalorder (!%p357_p6), %s2751_s23, 1  ;;  %p2273_p8 = scmp.ne.s32.totalorder (!%p357_p6), %s2751_s23, 0 }
  0x13   : > { %360 = sbr.rel (%p357_p6) target bundleno = 4894 (0x131e), region = 56 }
  0x1a   : > { %s420_s27 = scalar_select %p419_p7, %s2751_s23, 1 }
  0x1b   : > { %449 = sbr.rel (%p2273_p8) target bundleno = 38 (0x26), region = 60  ;;  %v450_v0 = vld [vmem:[%s3229_s1] sm:$0xff] (!%p2273_p8)  ;;  %vm460_vm0 = vcmask (!%p2273_p8), 261120   ;;  %v451_v2 = vld [vmem:[%s3229_s1 + $0x8] sm:$0xff] (!%p2273_p8)  ;;  %v465_v3 = vlaneseq (!%p2273_p8)  ;;  %v452_v6 = vld [vmem:[%s3229_s1 + $0x10] sm:$0xff] (!%p2273_p8)  ;;  %vm477_vm3 = vcmask (!%p2273_p8), 130048  }
  0x1c   : > { %s2324_s28 = sshll.u32 %s420_s27, 4  ;;  %s2327_s29 = sshll.u32 %s420_s27, 6  ;;  %v454_v1 = vld [vmem:[%s3230_s2] sm:$0xff] (!%p2273_p8)  ;;  %v455_v5 = vld [vmem:[%s3230_s2 + $0x8] sm:$0xff] (!%p2273_p8)  ;;  %v453_v7 = vld [vmem:[%s3229_s1 + $0x18] sm:$0xff] (!%p2273_p8) }
  0x1d   : > { %s2875_s12 = scalar_lea.vmem %s3231_s3, %s2324_s28  ;;  %s2880_s15 = scalar_lea.vmem %s3232_s4, %s2324_s28  ;;  %v456_v4 = vadd.f32 (!%p2273_p8), %v454_v1, %v450_v0  ;;  %v457_v8 = vadd.f32 (!%p2273_p8), %v455_v5, %v451_v2  ;;  %v458_v9 = vadd.f32 (!%p2273_p8), %v454_v1, %v452_v6  ;;  %v459_v10 = vadd.f32 (!%p2273_p8), %v455_v5, %v453_v7 }
  0x1e   : > { %s2885_s18 = scalar_lea.vmem %s3233_s5, %s2324_s28  ;;  %s2890_s21 = scalar_lea.vmem %s3234_s6, %s2327_s29  ;;  %v466_v11 = vshrl.u32 (!%p2273_p8), %v465_v3, 7  ;;  %v469_v12 = vand.u32 (!%p2273_p8), 127, %v465_v3  ;;  %v2762_v14 = vmov (!%p2273_p8), -1e+30  }
  0x1f   : > { %s2272_s22 = sshll.u32 %s420_s27, 3  ;;  %461 = vst.msk [vmem:[#allocation2] sm:$0xff] (!%p2273_p8), %vm460_vm0, %v456_v4  ;;  %462 = vst.msk [vmem:[#allocation2 + $0x8] sm:$0xff] (!%p2273_p8), %vm460_vm0, %v457_v8 }
  0x20   : > { %s2895_s11 = scalar_lea.vmem %s3235_s7, %s2272_s22  ;;  %463 = vst.msk [vmem:[#allocation2 + $0x10] sm:$0xff] (!%p2273_p8), %vm460_vm0, %v458_v9  ;;  %464 = vst.msk [vmem:[#allocation2 + $0x18] sm:$0xff] (!%p2273_p8), %vm460_vm0, %v459_v10  ;;  %v467_v13 = vadd.s32 (!%p2273_p8), 8, %v466_v11  ;;  %vm470_vm1 = vcmp.le.s32.totalorder (!%p2273_p8), %v469_v12, %v466_v11  ;;  %vm472_vm2 = vcmp.lt.s32.totalorder (!%p2273_p8), %v469_v12, 10 }
  0x21   : > { %vm473_vm4 = vmand (!%p2273_p8), %vm470_vm1, %vm472_vm2 }
  0x22   : > { %vm471_vm5 = vcmp.le.s32.totalorder %v469_v12, %v467_v13  ;;  %v475_v15 = vsel %vm473_vm4, 0.0, %v2762_v14 }
  0x23   : > { %vm474_vm6 = vmand %vm471_vm5, %vm472_vm2  ;;  %478 = vst.msk [vmem:[#allocation3] sm:$0xff] %vm477_vm3, %v475_v15 }
  0x24   : > { %v476_v16 = vsel %vm474_vm6, 0.0, %v2762_v14 }
  0x25   : > { %479 = vst.msk [vmem:[#allocation3 + $0x8] sm:$0xff] %vm477_vm3, %v476_v16 }
  0x26 PF: > { %vm485_vm7 = vcmask 261120   ;;  %v2584_v45 = vld [vmem:[%s2875_s12] sm:$0xff]   ;;  %v2585_v46 = vld [vmem:[%s2875_s12 + $0x8] sm:$0xff]   ;;  %v539_v52 = vlaneseq  ;;  %vm2764_vm8 = vmmov 0   ;;  %s2765_s12 = smov 96   ;;  %vm645_vm9 = vcmask 64512  }
  0x27   : > { %2385 = vmatprep.subr.bf16.mxu0 %v2584_v45  ;;  %v480_v62 = vld [vmem:[%s2895_s11] sm:$0xff]  ;;  %vm743_vm10 = vcmask 130048   ;;  %s2766_s13 = smov 64   ;;  %s2767_s14 = smov 88   ;;  %vm1142_vm11 = vcmask 130112   ;;  %vm1397_vm12 = vcmask 195712  }
  0x28   : > { %2386 = vmatpush3.bf16.msra.mxu0 %v2584_v45  ;;  %v2926_v58 = vshrl.u32 %v539_v52, 7  ;;  %s2768_s28 = smov 120   ;;  %s2769_s16 = smov 56   ;;  %vm1652_vm13 = vcmask 261312  }
  0x29   : > { %2387 = vmatprep.subr.bf16.mxu0 %v2585_v46  ;;  %s2770_s29 = smov 80   ;;  %s2771_s17 = smov 112  }
  0x2a   : > { %v481_v17 = vld [vmem:[#allocation2] sm:$0xff]  ;;  %v482_v19 = vld [vmem:[#allocation2 + $0x8] sm:$0xff]  ;;  %v541_v61 = vsub.s32 0, %v2926_v58  ;;  %v549_v2 = vsub.s32 1, %v2926_v58  ;;  %s2772_s0 = smov 48   ;;  %s2773_s27 = smov 72  }
  0x2b   : > { %v483_v18 = vld [vmem:[#allocation2 + $0x10] sm:$0xff]  ;;  %v486_v20 = vsel %vm485_vm7, %v481_v17, 0.0  ;;  %v484_v22 = vld [vmem:[#allocation2 + $0x18] sm:$0xff]  ;;  %v489_v23 = vsel %vm485_vm7, %v482_v19, 0.0  ;;  %s2774_s19 = smov 104   ;;  %s2775_s20 = smov 40  }
  0x2c   : > { %v492_v21 = vsel %vm485_vm7, %v483_v18, 0.0  ;;  %487 = vadd.xlane.f32.xlu0 %v486_v20  ;;  %v495_v24 = vsel %vm485_vm7, %v484_v22, 0.0  ;;  %2388 = vmatpush3.bf16.msra.mxu0 %v2585_v46  ;;  %v542_v1 = vrot.slane %v480_v62, %v541_v61  ;;  %v550_v7 = vrot.slane %v480_v62, %v549_v2  ;;  %v2964_v45 = vld [vmem:[#allocation3 + $0x8] sm:$0xff]  ;;  %s2776_s22 = smov 8   ;;  %s2777_s30 = smov 16  }
  0x2d   : > { %493 = vadd.xlane.f32.xlu1 %v492_v21  ;;  %v563_v20 = vsub.s32 7, %v2926_v58  ;;  %v2763_v21 = vmov 0.0   ;;  %p2312_p9 = scmp.ne.s32.totalorder %s2751_s23, 1 }
  0x2e   : > { %2393 = vmatprep.subr.bf16.mxu0 %v2763_v21  ;;  %2405 = vmatprep.subr.bf16.mxu1 %v2763_v21  ;;  %vm2038_vm14 = vcmask (!%p2312_p9), 253952   ;;  %vm2049_vm15 = vcmask (!%p2312_p9), 254976   ;;  %vm2780_vm0 = vmmov (!%p2312_p9), 0  }
  0x2f   : > { %2407 = vmatprep.mubr.msk.bf16.mxu1 %vm2764_vm8, %v2763_v21 }
  0x30   : > { %490 = vadd.xlane.f32.xlu0 %v489_v23 }
  0x31   : > { %496 = vadd.xlane.f32.xlu1 %v495_v24 }
  0xb9   : > { %v488_v25 = vpop.xlane.xlu0 %487 }
  0xba   : > { %v494_v26 = vpop.xlane.xlu1 %493  ;;  %v499_v27 = vmul.f32 0.03125, %v488_v25 }
  0xbb   : > { %v501_v28 = vmul.f32 0.03125, %v494_v26 }
  0xbc   : > { %v503_v29 = vsub.f32 %v481_v17, %v499_v27 }
  0xbd   : > { %v505_v30 = vsub.f32 %v483_v18, %v501_v28  ;;  %v491_v31 = vpop.xlane.xlu0 %490 }
  0xbe   : > { %v497_v32 = vpop.xlane.xlu1 %496  ;;  %v500_v33 = vmul.f32 0.03125, %v491_v31  ;;  %v507_v35 = vmul.f32 %v503_v29, %v503_v29 }
  0xbf   : > { %v502_v34 = vmul.f32 0.03125, %v497_v32  ;;  %v509_v36 = vmul.f32 %v505_v30, %v505_v30 }
  0xc0   : > { %v504_v37 = vsub.f32 %v482_v19, %v500_v33  ;;  %v511_v39 = vsel %vm485_vm7, %v507_v35, 0.0 }
  0xc1   : > { %v506_v38 = vsub.f32 %v484_v22, %v502_v34  ;;  %512 = vadd.xlane.f32.xlu0 %v511_v39  ;;  %v517_v40 = vsel %vm485_vm7, %v509_v36, 0.0  ;;  %v564_v22 = vrot.slane %v480_v62, %v563_v20 }
  0xc2   : > { %v508_v41 = vmul.f32 %v504_v37, %v504_v37 }
  0xc3   : > { %v510_v42 = vmul.f32 %v506_v38, %v506_v38 }
  0xc4   : > { %v514_v43 = vsel %vm485_vm7, %v508_v41, 0.0 }
  0xc5   : > { %518 = vadd.xlane.f32.xlu0 %v517_v40  ;;  %515 = vadd.xlane.f32.xlu1 %v514_v43  ;;  %v520_v44 = vsel %vm485_vm7, %v510_v42, 0.0  ;;  %v2962_v43 = vld [vmem:[#allocation3] sm:$0xff] }
  0xc9   : > { %521 = vadd.xlane.f32.xlu1 %v520_v44 }
 0x14e   : > { %v513_v47 = vpop.xlane.xlu0 %512 }
 0x14f   : > { %v523_v48 = vmul.f32 0.03125, %v513_v47 }
 0x151   : > { %v527_v49 = vadd.f32 1e-05, %v523_v48 }
 0x152   : > { %v516_v50 = vpop.xlane.xlu1 %515  ;;  %v519_v51 = vpop.xlane.xlu0 %518 }
 0x153   : > { %2598 = vrsqrt.f32 %v527_v49  ;;  %v524_v53 = vmul.f32 0.03125, %v516_v50  ;;  %v525_v54 = vmul.f32 0.03125, %v519_v51 }
 0x155   : > { %v528_v55 = vadd.f32 1e-05, %v524_v53  ;;  %v529_v56 = vadd.f32 1e-05, %v525_v54 }
 0x156   : > { %v522_v57 = vpop.xlane.xlu1 %521 }
 0x157   : > { %2600 = vrsqrt.f32 %v528_v55  ;;  %v526_v59 = vmul.f32 0.03125, %v522_v57 }
 0x158   : > { %2602 = vrsqrt.f32 %v529_v56 }
 0x159   : > { %v530_v60 = vadd.f32 1e-05, %v526_v59 }
 0x15b   : > { %2604 = vrsqrt.f32 %v530_v60 }
 0x15d   : > { %v2599_v63 = vpop.eup %2598 }
 0x15e   : > { %v535_v0 = vmul.f32 %v2599_v63, %v503_v29 }
 0x160   : > { %v543_v6 = vmul.f32 %v542_v1, %v535_v0 }
 0x161   : > { %v2601_v3 = vpop.eup %2600 }
 0x162   : > { %v2603_v4 = vpop.eup %2602  ;;  %v536_v5 = vmul.f32 %v2601_v3, %v504_v37  ;;  %v551_v12 = vadd.f32 %v550_v7, %v543_v6 }
 0x163   : > { %v537_v8 = vmul.f32 %v2603_v4, %v505_v30 }
 0x164   : > { %v544_v9 = vmul.f32 %v542_v1, %v536_v5 }
 0x165   : > { %v2605_v10 = vpop.eup %2604  ;;  %v545_v14 = vmul.f32 %v542_v1, %v537_v8 }
 0x166   : > { %v538_v11 = vmul.f32 %v2605_v10, %v506_v38  ;;  %v552_v13 = vadd.f32 %v550_v7, %v544_v9 }
 0x167   : > { %v553_v17 = vadd.f32 %v550_v7, %v545_v14 }
 0x168   : > { %v555_v15 = vpack.c.bf16 %v552_v13, %v551_v12  ;;  %v546_v16 = vmul.f32 %v542_v1, %v538_v11 }
 0x16a   : > { %2389 = vmatprep.mubr.msk.bf16.mxu0 %vm485_vm7, %v555_v15  ;;  %v554_v18 = vadd.f32 %v550_v7, %v546_v16 }
 0x16c   : > { %v556_v19 = vpack.c.bf16 %v554_v18, %v553_v17 }
 0x16e   : > { %2390 = vmatmul.mubr.msk.bf16.vlgmr.msra.gmra.mrb[0].mxu0 %vm485_vm7, %v556_v19 }
 0x16f   : > { %2395 = vmatprep.mubr.msk.bf16.mxu0 %vm2764_vm8, %v2763_v21 }
 0x241   : > { %v2391_v23 = vpop.f32.mrb[0].mxu0 }
 0x242   : > { %v626_v24 = vadd.f32 %v2391_v23, %v564_v22  ;;  %v617_v25 = vpop.f32.mrb[1].mxu0 }
 0x243   : > { %v618_v26 = vadd.f32 %v617_v25, %v564_v22  ;;  %v2392_v27 = vpop.f32.mrb[2].mxu0 }
 0x244   : > { %v629_v28 = vadd.f32 %v2392_v27, %v564_v22  ;;  %v620_v29 = vpop.f32.mrb[3].mxu0  ;;  %v634_v31 = vmul.f32 0.35355338, %v626_v24 }
 0x245   : > { %v621_v30 = vadd.f32 %v620_v29, %v564_v22  ;;  %v632_v34 = vmul.f32 0.35355338, %v618_v26 }
 0x246   : > { %v635_v32 = vmul.f32 0.35355338, %v629_v28  ;;  %v2940_v33 = vpack.c.bf16 %v629_v28, %v626_v24 }
 0x247   : > { %v633_v35 = vmul.f32 0.35355338, %v621_v30  ;;  %v2942_v36 = vpack.c.bf16 %v621_v30, %v618_v26 }
 0x248   : > { %v2944_v37 = vpack.c.bf16 %v635_v32, %v634_v31  ;;  %694 = vrot.lane.b32.xlu1 %v2940_v33, %s2765_s12 }
 0x249   : > { %v2947_v38 = vpack.c.bf16 %v633_v35, %v632_v34  ;;  %643 = vrot.lane.b32.xlu0 %v2942_v36, %s2765_s12  ;;  %s2778_s12 = smov 24  }
 0x2ba   : > { %v695_v41 = vpop.permute.xlu1 %694 }
 0x2bb   : > { %v644_v39 = vpop.permute.xlu0 %643  ;;  %v700_v42 = vsel %vm645_vm9, %v695_v41, 0 }
 0x2bc   : > { %v650_v40 = vsel %vm645_vm9, %v644_v39, 0 }
 0x2bd   : > { %2394 = vmatpush3.bf16.xpose.msra.mxu0 %v650_v40 }
 0x2be   : > { %2399 = vmatprep.subr.bf16.mxu0 %v2763_v21 }
 0x2c4   : > { %2396 = vmatmul.mubr.msk.bf16.vlgmr.msra.gmra.mrb[4].mxu0 %vm645_vm9, %v2947_v38 }
 0x2c5   : > { %2400 = vmatpush3.bf16.xpose.msra.mxu0 %v700_v42  ;;  %2401 = vmatprep.mubr.msk.bf16.mxu0 %vm2764_vm8, %v2763_v21 }
 0x2c6   : > { %2411 = vmatprep.subr.bf16.mxu0 %v2763_v21 }
 0x2cc   : > { %2402 = vmatmul.mubr.msk.bf16.vlgmr.msra.gmra.mrb[8].mxu0 %vm645_vm9, %v2944_v37 }
 0x2cd   : > { %2413 = vmatprep.mubr.msk.bf16.mxu0 %vm2764_vm8, %v2763_v21 }
 0x397   : > { %v686_v44 = vpop.f32.mrb[4].mxu0 }
 0x398   : > { %v687_v46 = vadd.f32 %v686_v44, %v2962_v43  ;;  %v2397_v47 = vpop.f32.mrb[5].mxu0 }
 0x399   : > { %v689_v48 = vpop.f32.mrb[6].mxu0 }
 0x39a   : > { %v690_v49 = vadd.f32 %v689_v48, %v2964_v45  ;;  %v2398_v50 = vpop.f32.mrb[7].mxu0  ;;  %v744_v51 = vsel %vm743_vm10, %v687_v46, -inf }
 0x39b   : > { %745 = vmax.xlane.f32.xlu1 %v744_v51 }
 0x39c   : > { %v747_v52 = vsel %vm743_vm10, %v690_v49, -inf }
 0x39d   : > { %748 = vmax.xlane.f32.xlu0 %v747_v52 }
 0x39f   : > { %v736_v53 = vpop.f32.mrb[8].mxu0 }
 0x3a0   : > { %v737_v54 = vadd.f32 %v736_v53, %v2962_v43  ;;  %v2403_v55 = vpop.f32.mrb[9].mxu0 }
 0x3a1   : > { %v739_v56 = vpop.f32.mrb[10].mxu0 }
 0x3a2   : > { %v740_v57 = vadd.f32 %v739_v56, %v2964_v45  ;;  %v2404_v59 = vpop.f32.mrb[11].mxu0  ;;  %v750_v60 = vsel %vm743_vm10, %v737_v54, -inf }
 0x3a3   : > { %751 = vmax.xlane.f32.xlu0 %v750_v60 }
 0x3a4   : > { %v753_v61 = vsel %vm743_vm10, %v740_v57, -inf }
 0x3a5   : > { %754 = vmax.xlane.f32.xlu1 %v753_v61 }
 0x428   : > { %v746_v62 = vpop.xlane.xlu1 %745 }
 0x429   : > { %v756_v63 = vsub.f32 %v687_v46, %v746_v62 }
 0x42a   : > { %v749_v0 = vpop.xlane.xlu0 %748 }
 0x42b   : > { %v760_v1 = vmul.f32 1.442695, %v756_v63  ;;  %v757_v2 = vsub.f32 %v690_v49, %v749_v0 }
 0x42d   : > { %2606 = vpow2.f32 %v760_v1  ;;  %v762_v3 = vmul.f32 1.442695, %v757_v2 }
 0x42f   : > { %2608 = vpow2.f32 %v762_v3 }
 0x430   : > { %v752_v4 = vpop.xlane.xlu0 %751 }
 0x431   : > { %v758_v5 = vsub.f32 %v737_v54, %v752_v4 }
 0x432   : > { %v755_v13 = vpop.xlane.xlu1 %754 }
 0x433   : > { %v764_v6 = vmul.f32 1.442695, %v758_v5  ;;  %v759_v14 = vsub.f32 %v740_v57, %v755_v13 }
 0x435   : > { %2610 = vpow2.f32 %v764_v6  ;;  %v766_v15 = vmul.f32 1.442695, %v759_v14 }
 0x437   : > { %v2607_v7 = vpop.eup %2606  ;;  %2612 = vpow2.f32 %v766_v15 }
 0x438   : > { %v768_v8 = vsel %vm743_vm10, %v2607_v7, 0.0 }
 0x439   : > { %v2609_v9 = vpop.eup %2608  ;;  %769 = vadd.xlane.f32.xlu0 %v768_v8 }
 0x43a   : > { %v771_v10 = vsel %vm743_vm10, %v2609_v9, 0.0 }
 0x43b   : > { %772 = vadd.xlane.f32.xlu1 %v771_v10 }
 0x43f   : > { %v2611_v11 = vpop.eup %2610 }
 0x440   : > { %v774_v12 = vsel %vm743_vm10, %v2611_v11, 0.0 }
 0x441   : > { %775 = vadd.xlane.f32.xlu0 %v774_v12  ;;  %v2613_v16 = vpop.eup %2612 }
 0x442   : > { %v777_v17 = vsel %vm743_vm10, %v2613_v16, 0.0 }
 0x44c   : > { %837 = vrot.lane.b32.xlu1 %v2940_v33, %s2766_s13 }
 0x450   : > { %891 = vrot.lane.b32.xlu1 %v2942_v36, %s2767_s14 }
 0x457   : > { %790 = vrot.lane.b32.xlu0 %v2942_v36, %s2766_s13 }
 0x45b   : > { %889 = vrot.lane.b32.xlu0 %v2947_v38, %s2768_s28 }
 0x474   : > { %778 = vadd.xlane.f32.xlu1 %v777_v17 }
 0x485   : > { %943 = vrot.lane.b32.xlu1 %v2940_v33, %s2767_s14 }
 0x489   : > { %941 = vrot.lane.b32.xlu1 %v2944_v37, %s2768_s28 }
 0x4c6   : > { %v770_v18 = vpop.xlane.xlu0 %769 }
 0x4c7   : > { %2614 = vrcp.f32 %v770_v18 }
 0x4c8   : > { %v773_v19 = vpop.xlane.xlu1 %772 }
 0x4c9   : > { %2616 = vrcp.f32 %v773_v19 }
 0x4cc   : > { %v838_v20 = vpop.permute.xlu1 %837 }
 0x4cd   : > { %2412 = vmatpush3.bf16.msra.mxu0 %v838_v20 }
 0x4ce   : > { %v776_v22 = vpop.xlane.xlu0 %775  ;;  %2423 = vmatprep.subr.bf16.mxu0 %v2763_v21 }
 0x4cf   : > { %2618 = vrcp.f32 %v776_v22 }
 0x4d0   : > { %v892_v29 = vpop.permute.xlu1 %891 }
 0x4d1   : > { %v2615_v23 = vpop.eup %2614  ;;  %v897_v30 = vsel %vm645_vm9, %v892_v29, 0 }
 0x4d2   : > { %v791_v24 = vpop.permute.xlu0 %790  ;;  %v784_v26 = vmul.f32 %v2615_v23, %v2607_v7 }
 0x4d3   : > { %v2617_v25 = vpop.eup %2616  ;;  %2406 = vmatpush3.bf16.msra.mxu1 %v791_v24 }
 0x4d4   : > { %v785_v27 = vmul.f32 %v2617_v25, %v2609_v9  ;;  %2417 = vmatprep.subr.bf16.mxu1 %v2763_v21 }
 0x4d6   : > { %v788_v28 = vpack.c.bf16 %v785_v27, %v784_v26  ;;  %v890_v31 = vpop.permute.xlu0 %889 }
 0x4d8   : > { %2408 = vmatmul.mubr.msk.bf16.vlgmr.msra.gmra.mrb[0].mxu1 %vm743_vm10, %v788_v28 }
 0x4d9   : > { %2419 = vmatprep.mubr.msk.bf16.mxu1 %vm2764_vm8, %v2763_v21  ;;  %v2619_v34 = vpop.eup %2618 }
 0x4da   : > { %v786_v39 = vmul.f32 %v2619_v34, %v2611_v11 }
 0x4dc   : > { %2418 = vmatpush3.bf16.xpose.msra.mxu1 %v897_v30 }
 0x4dd   : > { %2429 = vmatprep.subr.bf16.mxu1 %v2763_v21 }
 0x4e3   : > { %2420 = vmatmul.mubr.msk.bf16.vlgmr.msra.gmra.mrb[4].mxu1 %vm645_vm9, %v890_v31 }
 0x4e4   : > { %2431 = vmatprep.mubr.msk.bf16.mxu1 %vm2764_vm8, %v2763_v21 }
 0x501   : > { %v779_v32 = vpop.xlane.xlu1 %778 }
 0x502   : > { %2620 = vrcp.f32 %v779_v32 }
 0x505   : > { %v944_v41 = vpop.permute.xlu1 %943 }
 0x506   : > { %v949_v44 = vsel %vm645_vm9, %v944_v41, 0 }
 0x509   : > { %v942_v46 = vpop.permute.xlu1 %941 }
 0x50c   : > { %v2621_v35 = vpop.eup %2620 }
 0x50d   : > { %v787_v40 = vmul.f32 %v2621_v35, %v2613_v16 }
 0x50f   : > { %v789_v42 = vpack.c.bf16 %v787_v40, %v786_v39 }
 0x511   : > { %2414 = vmatmul.mubr.msk.bf16.vlgmr.msra.gmra.mrb[12].mxu0 %vm743_vm10, %v789_v42 }
 0x512   : > { %2424 = vmatpush3.bf16.xpose.msra.mxu0 %v949_v44  ;;  %2425 = vmatprep.mubr.msk.bf16.mxu0 %vm2764_vm8, %v2763_v21 }
 0x513   : > { %2435 = vmatprep.subr.bf16.mxu0 %v2763_v21 }
 0x519   : > { %2426 = vmatmul.mubr.msk.bf16.vlgmr.msra.gmra.mrb[16].mxu0 %vm645_vm9, %v942_v46 }
 0x51a   : > { %2437 = vmatprep.mubr.msk.bf16.mxu0 %vm2764_vm8, %v2763_v21 }
 0x5ab   : > { %v830_v47 = vpop.f32.mrb[0].mxu1 }
 0x5ac   : > { %v2409_v48 = vpop.f32.mrb[1].mxu1 }
 0x5ad   : > { %v833_v49 = vpop.f32.mrb[2].mxu1 }
 0x5ae   : > { %v884_v50 = vpack.c.bf16 %v833_v49, %v830_v47  ;;  %v2410_v51 = vpop.f32.mrb[3].mxu1 }
 0x5b0   : > { %886 = vst.msk [vmem:[#allocation4] sm:$0xff] %vm645_vm9, %v884_v50 }
 0x5b6   : > { %v933_v52 = vpop.f32.mrb[4].mxu1 }
 0x5b7   : > { %v934_v53 = vadd.f32 %v933_v52, %v2962_v43  ;;  %v2421_v54 = vpop.f32.mrb[5].mxu1 }
 0x5b8   : > { %v936_v55 = vpop.f32.mrb[6].mxu1 }
 0x5b9   : > { %v937_v56 = vadd.f32 %v936_v55, %v2964_v45  ;;  %v2422_v57 = vpop.f32.mrb[7].mxu1  ;;  %v992_v59 = vsel %vm743_vm10, %v934_v53, -inf }
 0x5ba   : > { %993 = vmax.xlane.f32.xlu0 %v992_v59 }
 0x5bb   : > { %v995_v60 = vsel %vm743_vm10, %v937_v56, -inf }
 0x5bc   : > { %996 = vmax.xlane.f32.xlu1 %v995_v60 }
 0x5e4   : > { %v877_v61 = vpop.f32.mrb[12].mxu0 }
 0x5e5   : > { %v2415_v62 = vpop.f32.mrb[13].mxu0 }
 0x5e6   : > { %v880_v63 = vpop.f32.mrb[14].mxu0 }
 0x5e7   : > { %v885_v0 = vpack.c.bf16 %v880_v63, %v877_v61  ;;  %v2416_v1 = vpop.f32.mrb[15].mxu0 }
 0x5e9   : > { %887 = vst.msk [vmem:[#allocation4 + $0x8] sm:$0xff] %vm645_vm9, %v885_v0 }
 0x5ec   : > { %v985_v2 = vpop.f32.mrb[16].mxu0 }
 0x5ed   : > { %v986_v3 = vadd.f32 %v985_v2, %v2962_v43  ;;  %v2427_v4 = vpop.f32.mrb[17].mxu0 }
 0x5ee   : > { %v988_v5 = vpop.f32.mrb[18].mxu0 }
 0x5ef   : > { %v989_v6 = vadd.f32 %v988_v5, %v2964_v45  ;;  %v2428_v7 = vpop.f32.mrb[19].mxu0  ;;  %v998_v8 = vsel %vm743_vm10, %v986_v3, -inf }
 0x5f0   : > { %999 = vmax.xlane.f32.xlu0 %v998_v8 }
 0x5f1   : > { %v1001_v9 = vsel %vm743_vm10, %v989_v6, -inf }
 0x5f4   : > { %1002 = vmax.xlane.f32.xlu0 %v1001_v9 }
 0x647   : > { %v994_v10 = vpop.xlane.xlu0 %993 }
 0x648   : > { %v1004_v11 = vsub.f32 %v934_v53, %v994_v10 }
 0x649   : > { %v997_v12 = vpop.xlane.xlu1 %996 }
 0x64a   : > { %v1008_v13 = vmul.f32 1.442695, %v1004_v11  ;;  %v1005_v14 = vsub.f32 %v937_v56, %v997_v12 }
 0x64c   : > { %2622 = vpow2.f32 %v1008_v13  ;;  %v1010_v15 = vmul.f32 1.442695, %v1005_v14 }
 0x64e   : > { %2624 = vpow2.f32 %v1010_v15 }
 0x656   : > { %v2623_v16 = vpop.eup %2622 }
 0x657   : > { %v1016_v17 = vsel %vm743_vm10, %v2623_v16, 0.0 }
 0x658   : > { %v2625_v18 = vpop.eup %2624  ;;  %1017 = vadd.xlane.f32.xlu0 %v1016_v17 }
 0x659   : > { %v1019_v19 = vsel %vm743_vm10, %v2625_v18, 0.0 }
 0x65a   : > { %1020 = vadd.xlane.f32.xlu1 %v1019_v19 }
 0x66b   : > { %1085 = vrot.lane.b32.xlu1 %v2940_v33, %s2769_s16 }
 0x66f   : > { %1147 = vrot.lane.b32.xlu1 %v2942_v36, %s2770_s29 }
 0x67d   : > { %v1000_v20 = vpop.xlane.xlu0 %999 }
 0x67e   : > { %v1006_v22 = vsub.f32 %v986_v3, %v1000_v20 }
 0x680   : > { %v1012_v23 = vmul.f32 1.442695, %v1006_v22 }
 0x681   : > { %v1003_v24 = vpop.xlane.xlu0 %1002 }
 0x682   : > { %2626 = vpow2.f32 %v1012_v23  ;;  %v1007_v25 = vsub.f32 %v989_v6, %v1003_v24 }
 0x684   : > { %v1014_v26 = vmul.f32 1.442695, %v1007_v25 }
 0x686   : > { %2628 = vpow2.f32 %v1014_v26 }
 0x68c   : > { %v2627_v27 = vpop.eup %2626 }
 0x68d   : > { %v1022_v28 = vsel %vm743_vm10, %v2627_v27, 0.0 }
 0x68e   : > { %1023 = vadd.xlane.f32.xlu0 %v1022_v28 }
 0x690   : > { %v2629_v29 = vpop.eup %2628 }
 0x691   : > { %v1025_v30 = vsel %vm743_vm10, %v2629_v29, 0.0 }
 0x693   : > { %1026 = vadd.xlane.f32.xlu1 %v1025_v30 }
 0x6a4   : > { %1038 = vrot.lane.b32.xlu0 %v2942_v36, %s2769_s16  ;;  %1198 = vrot.lane.b32.xlu1 %v2940_v33, %s2770_s29 }
 0x6a8   : > { %1145 = vrot.lane.b32.xlu0 %v2947_v38, %s2771_s17  ;;  %1196 = vrot.lane.b32.xlu1 %v2944_v37, %s2771_s17 }
 0x6e5   : > { %v1018_v34 = vpop.xlane.xlu0 %1017 }
 0x6e7   : > { %v1021_v31 = vpop.xlane.xlu1 %1020 }
 0x6e8   : > { %2630 = vrcp.f32 %v1021_v31 }
 0x6e9   : > { %2632 = vrcp.f32 %v1018_v34 }
 0x6eb   : > { %v1086_v32 = vpop.permute.xlu1 %1085 }
 0x6ec   : > { %2436 = vmatpush3.bf16.msra.mxu0 %v1086_v32 }
 0x6ed   : > { %2447 = vmatprep.subr.bf16.mxu0 %v2763_v21 }
 0x6ef   : > { %v1148_v41 = vpop.permute.xlu1 %1147 }
 0x6f0   : > { %v1153_v49 = vsel %vm645_vm9, %v1148_v41, 0 }
 0x6f2   : > { %v2631_v35 = vpop.eup %2630 }
 0x6f3   : > { %v2633_v40 = vpop.eup %2632  ;;  %v1033_v42 = vmul.f32 %v2631_v35, %v2625_v18 }
 0x6f4   : > { %v1032_v44 = vmul.f32 %v2633_v40, %v2623_v16 }
 0x6f6   : > { %v1036_v48 = vpack.c.bf16 %v1033_v42, %v1032_v44 }
 0x71b   : > { %v1024_v39 = vpop.xlane.xlu0 %1023 }
 0x71c   : > { %2634 = vrcp.f32 %v1024_v39 }
 0x71f   : > { %v1039_v46 = vpop.permute.xlu0 %1038 }
 0x720   : > { %v1027_v47 = vpop.xlane.xlu1 %1026  ;;  %2430 = vmatpush3.bf16.msra.mxu1 %v1039_v46 }
 0x721   : > { %2636 = vrcp.f32 %v1027_v47  ;;  %2441 = vmatprep.subr.bf16.mxu1 %v2763_v21 }
 0x723   : > { %2432 = vmatmul.mubr.msk.bf16.vlgmr.msra.gmra.mrb[8].mxu1 %vm743_vm10, %v1036_v48  ;;  %v1146_v56 = vpop.permute.xlu0 %1145 }
 0x724   : > { %2443 = vmatprep.mubr.msk.bf16.mxu1 %vm2764_vm8, %v2763_v21  ;;  %v1199_v54 = vpop.permute.xlu1 %1198 }
 0x725   : > { %v1204_v57 = vsel %vm645_vm9, %v1199_v54, 0 }
 0x726   : > { %v2635_v50 = vpop.eup %2634 }
 0x727   : > { %v1034_v52 = vmul.f32 %v2635_v50, %v2627_v27 }
 0x728   : > { %v1197_v59 = vpop.permute.xlu1 %1196 }
 0x729   : > { %2442 = vmatpush3.bf16.xpose.msra.mxu1 %v1153_v49 }
 0x72a   : > { %2453 = vmatprep.subr.bf16.mxu1 %v2763_v21 }
 0x72b   : > { %v2637_v51 = vpop.eup %2636 }
 0x72c   : > { %v1035_v53 = vmul.f32 %v2637_v51, %v2629_v29 }
 0x72e   : > { %v1037_v55 = vpack.c.bf16 %v1035_v53, %v1034_v52 }
 0x730   : > { %2438 = vmatmul.mubr.msk.bf16.vlgmr.msra.gmra.mrb[20].mxu0 %vm743_vm10, %v1037_v55  ;;  %2444 = vmatmul.mubr.msk.bf16.vlgmr.msra.gmra.mrb[12].mxu1 %vm645_vm9, %v1146_v56 }
 0x731   : > { %2448 = vmatpush3.bf16.xpose.msra.mxu0 %v1204_v57  ;;  %2449 = vmatprep.mubr.msk.bf16.mxu0 %vm2764_vm8, %v2763_v21 }
 0x732   : > { %2459 = vmatprep.subr.bf16.mxu0 %v2763_v21  ;;  %2455 = vmatprep.mubr.msk.bf16.mxu1 %vm2764_vm8, %v2763_v21 }
 0x738   : > { %2450 = vmatmul.mubr.msk.bf16.vlgmr.msra.gmra.mrb[24].mxu0 %vm645_vm9, %v1197_v59 }
 0x739   : > { %2461 = vmatprep.mubr.msk.bf16.mxu0 %vm2764_vm8, %v2763_v21 }
 0x7f6   : > { %v3040_v60 = vpop.f32.mrb[8].mxu1 }
 0x7f7   : > { %v2433_v61 = vpop.f32.mrb[9].mxu1 }
 0x7f8   : > { %v3042_v62 = vpop.f32.mrb[10].mxu1 }
 0x7f9   : > { %v1132_v63 = vpack.c.bf16 %v3042_v62, %v3040_v60  ;;  %v2434_v0 = vpop.f32.mrb[11].mxu1 }
 0x803   : > { %v3046_v1 = vpop.f32.mrb[20].mxu0  ;;  %v1189_v2 = vpop.f32.mrb[12].mxu1 }
 0x804   : > { %v1190_v3 = vadd.f32 %v1189_v2, %v2962_v43  ;;  %v2439_v4 = vpop.f32.mrb[21].mxu0  ;;  %v2445_v5 = vpop.f32.mrb[13].mxu1 }
 0x805   : > { %v3049_v6 = vpop.f32.mrb[22].mxu0  ;;  %v1192_v7 = vpop.f32.mrb[14].mxu1 }
 0x806   : > { %v1133_v8 = vpack.c.bf16 %v3049_v6, %v3046_v1  ;;  %v1193_v9 = vadd.f32 %v1192_v7, %v2964_v45  ;;  %v2440_v10 = vpop.f32.mrb[23].mxu0  ;;  %v2446_v11 = vpop.f32.mrb[15].mxu1  ;;  %v1247_v12 = vsel %vm743_vm10, %v1190_v3, -inf }
 0x807   : > { %1248 = vmax.xlane.f32.xlu0 %v1247_v12 }
 0x808   : > { %v1250_v13 = vsel %vm743_vm10, %v1193_v9, -inf }
 0x809   : > { %1251 = vmax.xlane.f32.xlu1 %v1250_v13 }
 0x80b   : > { %v1240_v14 = vpop.f32.mrb[24].mxu0 }
 0x80c   : > { %v1241_v15 = vadd.f32 %v1240_v14, %v2962_v43  ;;  %v2451_v16 = vpop.f32.mrb[25].mxu0 }
 0x80d   : > { %v1243_v17 = vpop.f32.mrb[26].mxu0 }
 0x80e   : > { %v1244_v18 = vadd.f32 %v1243_v17, %v2964_v45  ;;  %v2452_v19 = vpop.f32.mrb[27].mxu0  ;;  %v1253_v20 = vsel %vm743_vm10, %v1241_v15, -inf }
 0x80f   : > { %1254 = vmax.xlane.f32.xlu0 %v1253_v20 }
 0x810   : > { %v1256_v22 = vsel %vm743_vm10, %v1244_v18, -inf }
 0x813   : > { %1257 = vmax.xlane.f32.xlu0 %v1256_v22 }
 0x894   : > { %v1249_v23 = vpop.xlane.xlu0 %1248 }
 0x895   : > { %v1259_v24 = vsub.f32 %v1190_v3, %v1249_v23 }
 0x896   : > { %v1252_v25 = vpop.xlane.xlu1 %1251 }
 0x897   : > { %v1263_v26 = vmul.f32 1.442695, %v1259_v24  ;;  %v1260_v27 = vsub.f32 %v1193_v9, %v1252_v25 }
 0x899   : > { %2638 = vpow2.f32 %v1263_v26  ;;  %v1265_v28 = vmul.f32 1.442695, %v1260_v27 }
 0x89b   : > { %2640 = vpow2.f32 %v1265_v28 }
 0x89c   : > { %v1255_v29 = vpop.xlane.xlu0 %1254 }
 0x89d   : > { %v1261_v30 = vsub.f32 %v1241_v15, %v1255_v29 }
 0x89f   : > { %v1267_v31 = vmul.f32 1.442695, %v1261_v30 }
 0x8a0   : > { %v1258_v42 = vpop.xlane.xlu0 %1257 }
 0x8a1   : > { %2642 = vpow2.f32 %v1267_v31  ;;  %v1262_v44 = vsub.f32 %v1244_v18, %v1258_v42 }
 0x8a3   : > { %v2639_v32 = vpop.eup %2638  ;;  %v1269_v46 = vmul.f32 1.442695, %v1262_v44 }
 0x8a4   : > { %v1271_v34 = vsel %vm743_vm10, %v2639_v32, 0.0 }
 0x8a5   : > { %v2641_v35 = vpop.eup %2640  ;;  %1272 = vadd.xlane.f32.xlu0 %v1271_v34  ;;  %2644 = vpow2.f32 %v1269_v46 }
 0x8a6   : > { %v1274_v39 = vsel %vm743_vm10, %v2641_v35, 0.0 }
 0x8a7   : > { %1275 = vadd.xlane.f32.xlu1 %v1274_v39 }
 0x8ab   : > { %v2643_v40 = vpop.eup %2642 }
 0x8ac   : > { %v1277_v41 = vsel %vm743_vm10, %v2643_v40, 0.0 }
 0x8ad   : > { %1278 = vadd.xlane.f32.xlu0 %v1277_v41 }
 0x8af   : > { %v2645_v47 = vpop.eup %2644 }
 0x8b0   : > { %v1280_v48 = vsel %vm743_vm10, %v2645_v47, 0.0 }
 0x8b8   : > { %1340 = vrot.lane.b32.xlu1 %v2940_v33, %s2772_s0 }
 0x8bc   : > { %1402 = vrot.lane.b32.xlu1 %v2942_v36, %s2773_s27 }
 0x8c3   : > { %1293 = vrot.lane.b32.xlu0 %v2942_v36, %s2772_s0 }
 0x8c7   : > { %1400 = vrot.lane.b32.xlu0 %v2947_v38, %s2774_s19 }
 0x8e0   : > { %1281 = vadd.xlane.f32.xlu1 %v1280_v48 }
 0x8f1   : > { %1453 = vrot.lane.b32.xlu1 %v2940_v33, %s2773_s27 }
 0x8f5   : > { %1451 = vrot.lane.b32.xlu1 %v2944_v37, %s2774_s19 }
 0x932   : > { %v1273_v49 = vpop.xlane.xlu0 %1272 }
 0x933   : > { %2646 = vrcp.f32 %v1273_v49 }
 0x934   : > { %v1276_v50 = vpop.xlane.xlu1 %1275 }
 0x935   : > { %2648 = vrcp.f32 %v1276_v50 }
 0x938   : > { %v1341_v51 = vpop.permute.xlu1 %1340 }
 0x939   : > { %2460 = vmatpush3.bf16.msra.mxu0 %v1341_v51 }
 0x93a   : > { %v1279_v52 = vpop.xlane.xlu0 %1278  ;;  %2471 = vmatprep.subr.bf16.mxu0 %v2763_v21 }
 0x93b   : > { %2650 = vrcp.f32 %v1279_v52 }
 0x93c   : > { %v1403_v59 = vpop.permute.xlu1 %1402 }
 0x93d   : > { %v2647_v38 = vpop.eup %2646  ;;  %v1408_v37 = vsel %vm645_vm9, %v1403_v59, 0 }
 0x93e   : > { %v1294_v53 = vpop.permute.xlu0 %1293  ;;  %v1287_v55 = vmul.f32 %v2647_v38, %v2639_v32 }
 0x93f   : > { %v2649_v54 = vpop.eup %2648  ;;  %2454 = vmatpush3.bf16.msra.mxu1 %v1294_v53 }
 0x940   : > { %v1288_v56 = vmul.f32 %v2649_v54, %v2641_v35  ;;  %2465 = vmatprep.subr.bf16.mxu1 %v2763_v21 }
 0x942   : > { %v1291_v57 = vpack.c.bf16 %v1288_v56, %v1287_v55  ;;  %v1401_v61 = vpop.permute.xlu0 %1400 }
 0x944   : > { %2456 = vmatmul.mubr.msk.bf16.vlgmr.msra.gmra.mrb[16].mxu1 %vm743_vm10, %v1291_v57 }
 0x945   : > { %2467 = vmatprep.mubr.msk.bf16.mxu1 %vm2764_vm8, %v2763_v21  ;;  %v2651_v2 = vpop.eup %2650 }
 0x946   : > { %v1289_v4 = vmul.f32 %v2651_v2, %v2643_v40 }
 0x948   : > { %2466 = vmatpush3.bf16.xpose.msra.mxu1 %v1408_v37 }
 0x949   : > { %2477 = vmatprep.subr.bf16.mxu1 %v2763_v21 }
 0x94f   : > { %2468 = vmatmul.mubr.msk.bf16.vlgmr.msra.gmra.mrb[20].mxu1 %vm645_vm9, %v1401_v61 }
 0x950   : > { %2479 = vmatprep.mubr.msk.bf16.mxu1 %vm2764_vm8, %v2763_v21 }
 0x96d   : > { %v1282_v0 = vpop.xlane.xlu1 %1281 }
 0x96e   : > { %2652 = vrcp.f32 %v1282_v0 }
 0x971   : > { %v1454_v7 = vpop.permute.xlu1 %1453 }
 0x972   : > { %v1459_v10 = vsel %vm645_vm9, %v1454_v7, 0 }
 0x975   : > { %v1452_v11 = vpop.permute.xlu1 %1451 }
 0x978   : > { %v2653_v3 = vpop.eup %2652 }
 0x979   : > { %v1290_v5 = vmul.f32 %v2653_v3, %v2645_v47 }
 0x97b   : > { %v1292_v9 = vpack.c.bf16 %v1290_v5, %v1289_v4 }
 0x97d   : > { %2462 = vmatmul.mubr.msk.bf16.vlgmr.msra.gmra.mrb[28].mxu0 %vm743_vm10, %v1292_v9 }
 0x97e   : > { %2472 = vmatpush3.bf16.xpose.msra.mxu0 %v1459_v10  ;;  %2473 = vmatprep.mubr.msk.bf16.mxu0 %vm2764_vm8, %v2763_v21 }
 0x97f   : > { %2483 = vmatprep.subr.bf16.mxu0 %v2763_v21 }
 0x985   : > { %2474 = vmatmul.mubr.msk.bf16.vlgmr.msra.gmra.mrb[32].mxu0 %vm645_vm9, %v1452_v11 }
 0x986   : > { %2485 = vmatprep.mubr.msk.bf16.mxu0 %vm2764_vm8, %v2763_v21 }
 0xa17   : > { %v3088_v12 = vpop.f32.mrb[16].mxu1 }
 0xa18   : > { %v2457_v13 = vpop.f32.mrb[17].mxu1 }
 0xa19   : > { %v1336_v14 = vpop.f32.mrb[18].mxu1 }
 0xa1a   : > { %v1387_v15 = vpack.c.bf16 %v1336_v14, %v3088_v12  ;;  %v2458_v16 = vpop.f32.mrb[19].mxu1 }
 0xa22   : > { %v1444_v17 = vpop.f32.mrb[20].mxu1 }
 0xa23   : > { %v1445_v18 = vadd.f32 %v1444_v17, %v2962_v43  ;;  %v2469_v19 = vpop.f32.mrb[21].mxu1 }
 0xa24   : > { %v1447_v20 = vpop.f32.mrb[22].mxu1 }
 0xa25   : > { %v1448_v22 = vadd.f32 %v1447_v20, %v2964_v45  ;;  %v2470_v23 = vpop.f32.mrb[23].mxu1  ;;  %v1502_v24 = vsel %vm743_vm10, %v1445_v18, -inf  ;;  %v2586_v20 = vld [vmem:[%s2880_s15] sm:$0xff]  }
 0xa26   : > { %1503 = vmax.xlane.f32.xlu0 %v1502_v24 }
 0xa27   : > { %v1505_v21 = vsel %vm743_vm10, %v1448_v22, -inf }
 0xa28   : > { %1506 = vmax.xlane.f32.xlu1 %v1505_v21 }
 0xa50   : > { %v1380_v25 = vpop.f32.mrb[28].mxu0 }
 0xa51   : > { %v2463_v26 = vpop.f32.mrb[29].mxu0 }
 0xa52   : > { %v1383_v27 = vpop.f32.mrb[30].mxu0 }
 0xa53   : > { %v1388_v28 = vpack.c.bf16 %v1383_v27, %v1380_v25  ;;  %v2464_v29 = vpop.f32.mrb[31].mxu0 }
 0xa58   : > { %v1495_v30 = vpop.f32.mrb[32].mxu0 }
 0xa59   : > { %v1496_v31 = vadd.f32 %v1495_v30, %v2962_v43  ;;  %v2475_v32 = vpop.f32.mrb[33].mxu0 }
 0xa5a   : > { %v1498_v34 = vpop.f32.mrb[34].mxu0 }
 0xa5b   : > { %v1499_v35 = vadd.f32 %v1498_v34, %v2964_v45  ;;  %v2476_v39 = vpop.f32.mrb[35].mxu0  ;;  %v1508_v40 = vsel %vm743_vm10, %v1496_v31, -inf  ;;  %v3119_v34 = vld [vmem:[%s2895_s11] sm:$0xff] }
 0xa5c   : > { %1509 = vmax.xlane.f32.xlu0 %v1508_v40  ;;  %v2687_v40 = vld [vmem:[#allocation2 + $0x10] sm:$0xff] }
 0xa5d   : > { %v1511_v41 = vsel %vm743_vm10, %v1499_v35, -inf }
 0xa60   : > { %1512 = vmax.xlane.f32.xlu0 %v1511_v41 }
 0xab3   : > { %v1504_v42 = vpop.xlane.xlu0 %1503 }
 0xab4   : > { %v1514_v44 = vsub.f32 %v1445_v18, %v1504_v42  ;;  %v2688_v42 = vld [vmem:[#allocation2] sm:$0xff] }
 0xab5   : > { %v1507_v46 = vpop.xlane.xlu1 %1506 }
 0xab6   : > { %v1518_v47 = vmul.f32 1.442695, %v1514_v44  ;;  %v1515_v48 = vsub.f32 %v1448_v22, %v1507_v46  ;;  %v2587_v22 = vld [vmem:[%s2880_s15 + $0x8] sm:$0xff]   ;;  %s2035_s15 = sld [smem:[#allocation7]] (!%p2312_p9) }
 0xab8   : > { %2654 = vpow2.f32 %v1518_v47  ;;  %v1520_v49 = vmul.f32 1.442695, %v1515_v48 }
 0xaba   : > { %2656 = vpow2.f32 %v1520_v49  ;;  %v2689_v49 = vld [vmem:[#allocation2 + $0x8] sm:$0xff] }
 0xac2   : > { %v2655_v43 = vpop.eup %2654 }
 0xac3   : > { %v1526_v50 = vsel %vm743_vm10, %v2655_v43, 0.0 }
 0xac4   : > { %v2657_v51 = vpop.eup %2656  ;;  %1527 = vadd.xlane.f32.xlu0 %v1526_v50 }
 0xac5   : > { %v1529_v45 = vsel %vm743_vm10, %v2657_v51, 0.0 }
 0xac6   : > { %1530 = vadd.xlane.f32.xlu1 %v1529_v45 }
 0xae9   : > { %v1510_v52 = vpop.xlane.xlu0 %1509 }
 0xaea   : > { %v1516_v38 = vsub.f32 %v1496_v31, %v1510_v52  ;;  %v1734_v31 = vsub.s32 4, %v2926_v58 }
 0xaec   : > { %v1522_v53 = vmul.f32 1.442695, %v1516_v38 }
 0xaed   : > { %v1513_v54 = vpop.xlane.xlu0 %1512 }
 0xaee   : > { %2658 = vpow2.f32 %v1522_v53  ;;  %v1517_v55 = vsub.f32 %v1499_v35, %v1513_v54  ;;  %v1735_v35 = vrot.slane %v3119_v34, %v1734_v31 }
 0xaf0   : > { %v1524_v56 = vmul.f32 1.442695, %v1517_v55 }
 0xaf2   : > { %2660 = vpow2.f32 %v1524_v56 }
 0xaf8   : > { %v2659_v57 = vpop.eup %2658 }
 0xaf9   : > { %v1532_v59 = vsel %vm743_vm10, %v2659_v57, 0.0 }
 0xafa   : > { %1533 = vadd.xlane.f32.xlu0 %v1532_v59 }
 0xafc   : > { %v2661_v37 = vpop.eup %2660 }
 0xafd   : > { %v1535_v61 = vsel %vm743_vm10, %v2661_v37, 0.0 }
 0xafe   : > { %1536 = vadd.xlane.f32.xlu1 %v1535_v61 }
 0xb0f   : > { %1595 = vrot.lane.b32.xlu1 %v2940_v33, %s2775_s20 }
 0xb10   : > { %1548 = vrot.lane.b32.xlu0 %v2942_v36, %s2775_s20 }
 0xb13   : > { %1136 = vrot.lane.b32.xlu1 %v1132_v63, %s2776_s22 }
 0xb14   : > { %1391 = vrot.lane.b32.xlu0 %v1387_v15, %s2777_s30 }
 0xb17   : > { %1138 = vrot.lane.b32.xlu1 %v1133_v8, %s2776_s22 }
 0xb1b   : > { %1393 = vrot.lane.b32.xlu1 %v1388_v28, %s2777_s30 }
 0xb51   : > { %v1528_v2 = vpop.xlane.xlu0 %1527 }
 0xb53   : > { %v1531_v0 = vpop.xlane.xlu1 %1530 }
 0xb54   : > { %2662 = vrcp.f32 %v1531_v0 }
 0xb55   : > { %2664 = vrcp.f32 %v1528_v2 }
 0xb5e   : > { %v2663_v3 = vpop.eup %2662 }
 0xb5f   : > { %v2665_v4 = vpop.eup %2664  ;;  %v1543_v36 = vmul.f32 %v2663_v3, %v2657_v51  ;;  %v2690_v51 = vld [vmem:[#allocation2 + $0x18] sm:$0xff] }
 0xb60   : > { %v1542_v5 = vmul.f32 %v2665_v4, %v2655_v43 }
 0xb62   : > { %v1546_v62 = vpack.c.bf16 %v1543_v36, %v1542_v5 }
 0xb87   : > { %v1534_v33 = vpop.xlane.xlu0 %1533 }
 0xb88   : > { %2666 = vrcp.f32 %v1534_v33 }
 0xb8b   : > { %v1537_v7 = vpop.xlane.xlu1 %1536  ;;  %v1549_v60 = vpop.permute.xlu0 %1548 }
 0xb8c   : > { %2668 = vrcp.f32 %v1537_v7  ;;  %2478 = vmatpush3.bf16.msra.mxu1 %v1549_v60 }
 0xb8d   : > { %2489 = vmatprep.subr.bf16.mxu1 %v2586_v20 }
 0xb8f   : > { %v1596_v63 = vpop.permute.xlu1 %1595  ;;  %2480 = vmatmul.mubr.msk.bf16.vlgmr.msra.gmra.mrb[24].mxu1 %vm743_vm10, %v1546_v62  ;;  %v1392_v8 = vpop.permute.xlu0 %1391 }
 0xb90   : > { %2484 = vmatpush3.bf16.msra.mxu0 %v1596_v63  ;;  %2490 = vmatpush3.bf16.msra.mxu1 %v2586_v20 }
 0xb91   : > { %2491 = vmatprep.subr.bf16.mxu1 %v2587_v22 }
 0xb92   : > { %v2667_v6 = vpop.eup %2666 }
 0xb93   : > { %v1137_v1 = vpop.permute.xlu1 %1136  ;;  %v1544_v10 = vmul.f32 %v2667_v6, %v2659_v57 }
 0xb94   : > { %1143 = vst.msk [vmem:[#allocation4] sm:$0xff] %vm1142_vm11, %v1137_v1  ;;  %2492 = vmatpush3.bf16.msra.mxu1 %v2587_v22 }
 0xb95   : > { %1398 = vst.msk [vmem:[#allocation4] sm:$0xff] %vm1397_vm12, %v1392_v8 }
 0xb96   : > { %v2669_v9 = vpop.eup %2668 }
 0xb97   : > { %v1545_v11 = vmul.f32 %v2669_v9, %v2661_v37  ;;  %v1139_v12 = vpop.permute.xlu1 %1138 }
 0xb98   : > { %1144 = vst.msk [vmem:[#allocation4 + $0x8] sm:$0xff] %vm1142_vm11, %v1139_v12  ;;  %v2589_v12 = vld [vmem:[%s2885_s18 + $0x8] sm:$0xff]  }
 0xb99   : > { %v1547_v13 = vpack.c.bf16 %v1545_v11, %v1544_v10  ;;  %v2588_v11 = vld [vmem:[%s2885_s18] sm:$0xff]   ;;  %s2313_s18 = sld [smem:[#allocation7 + $0x1]] (!%p2312_p9) }
 0xb9a   : > { %2497 = vmatprep.subr.bf16.mxu0 %v2588_v11 }
 0xb9b   : > { %v1394_v14 = vpop.permute.xlu1 %1393  ;;  %2486 = vmatmul.mubr.msk.bf16.vlgmr.msra.gmra.mrb[36].mxu0 %vm743_vm10, %v1547_v13 }
 0xb9c   : > { %1399 = vst.msk [vmem:[#allocation4 + $0x8] sm:$0xff] %vm1397_vm12, %v1394_v14  ;;  %2498 = vmatpush3.bf16.msra.mxu0 %v2588_v11 }
 0xb9d   : > { %2499 = vmatprep.subr.bf16.mxu0 %v2589_v12 }
 0xb9f   : > { %s2196_s11 = scalar_lea.vmem (!%p2312_p9), [#allocation2], %s2313_s18 }
 0xba0   : > { %2500 = vmatpush3.bf16.msra.mxu0 %v2589_v12 }
 0xc62   : > { %v1588_v15 = vpop.f32.mrb[24].mxu1 }
 0xc63   : > { %v2481_v16 = vpop.f32.mrb[25].mxu1 }
 0xc64   : > { %v1591_v17 = vpop.f32.mrb[26].mxu1 }
 0xc65   : > { %v1642_v18 = vpack.c.bf16 %v1591_v17, %v1588_v15  ;;  %v2482_v19 = vpop.f32.mrb[27].mxu1 }
 0xc67   : > { %1646 = vrot.lane.b32.xlu0 %v1642_v18, %s2778_s12 }
 0xc6e   : > { %v1635_v23 = vpop.f32.mrb[36].mxu0 }
 0xc6f   : > { %v2487_v24 = vpop.f32.mrb[37].mxu0 }
 0xc70   : > { %v1638_v21 = vpop.f32.mrb[38].mxu0 }
 0xc71   : > { %v1643_v25 = vpack.c.bf16 %v1638_v21, %v1635_v23  ;;  %v2488_v26 = vpop.f32.mrb[39].mxu0  ;;  %v1794_v21 = vsub.s32 2, %v2926_v58 }
 0xc73   : > { %1648 = vrot.lane.b32.xlu1 %v1643_v25, %s2778_s12  ;;  %v1795_v26 = vrot.slane %v3119_v34, %v1794_v21 }
 0xcd9   : > { %v1647_v27 = vpop.permute.xlu0 %1646 }
 0xcda   : > { %1653 = vst.msk [vmem:[#allocation4] sm:$0xff] %vm1652_vm13, %v1647_v27  ;;  %v1802_v27 = vsub.s32 3, %v2926_v58 }
 0xce1   : > { %v1655_v28 = vld [vmem:[#allocation4] sm:$0xff] }
 0xce2   : > { %2493 = vmatprep.mubr.msk.bf16.mxu1 %vm485_vm7, %v1655_v28 }
 0xce5   : > { %v1649_v29 = vpop.permute.xlu1 %1648 }
 0xce6   : > { %1654 = vst.msk [vmem:[#allocation4 + $0x8] sm:$0xff] %vm1652_vm13, %v1649_v29 }
 0xced   : > { %v1656_v30 = vld [vmem:[#allocation4 + $0x8] sm:$0xff] }
 0xcee   : > { %2494 = vmatmul.mubr.msk.bf16.vlgmr.msra.gmra.mrb[28].mxu1 %vm485_vm7, %v1656_v30 }
 0xdc1   : > { %v2495_v32 = vpop.f32.mrb[28].mxu1 }
 0xdc2   : > { %v1713_v39 = vpop.f32.mrb[29].mxu1  ;;  %v1730_v41 = vadd.f32 %v2687_v40, %v2495_v32 }
 0xdc3   : > { %v1728_v44 = vadd.f32 %v2688_v42, %v1713_v39  ;;  %v2496_v46 = vpop.f32.mrb[30].mxu1 }
 0xdc4   : > { %v1716_v47 = vpop.f32.mrb[31].mxu1  ;;  %v3124_v50 = vadd.f32 %v1735_v35, %v1730_v41  ;;  %v1731_v45 = vadd.f32 %v2690_v51, %v2496_v46 }
 0xdc5   : > { %v3122_v48 = vadd.f32 %v1735_v35, %v1728_v44  ;;  %v1729_v43 = vadd.f32 %v2689_v49, %v1716_v47 }
 0xdc6   : > { %v3132_v54 = vadd.f32 %v1735_v35, %v1731_v45  ;;  %v1746_v55 = vsel %vm485_vm7, %v3124_v50, 0.0 }
 0xdc7   : > { %v3126_v52 = vadd.f32 %v1735_v35, %v1729_v43  ;;  %v1740_v38 = vsel %vm485_vm7, %v3122_v48, 0.0  ;;  %v1803_v35 = vrot.slane %v3119_v34, %v1802_v27 }
 0xdc8   : > { %1741 = vadd.xlane.f32.xlu0 %v1740_v38  ;;  %v1749_v56 = vsel %vm485_vm7, %v3132_v54, 0.0 }
 0xdc9   : > { %v1743_v53 = vsel %vm485_vm7, %v3126_v52, 0.0 }
 0xdca   : > { %1744 = vadd.xlane.f32.xlu1 %v1743_v53 }
 0xdcc   : > { %1747 = vadd.xlane.f32.xlu0 %v1746_v55  ;;  %v2590_v55 = vld [vmem:[%s2890_s21] sm:$0xff]  }
 0xdcd   : > { %2505 = vmatprep.subr.bf16.mxu1 %v2590_v55 }
 0xdce   : > { %2506 = vmatpush3.bf16.msra.mxu1 %v2590_v55  ;;  %v2315_v55 = vld [vmem:[%s3236_s8] ss:$0 sm:$0xff] (!%p2312_p9) }
 0xdd0   : > { %1750 = vadd.xlane.f32.xlu0 %v1749_v56  ;;  %v2591_v56 = vld [vmem:[%s2890_s21 + $0x8] sm:$0xff]  }
 0xdd1   : > { %2507 = vmatprep.subr.bf16.mxu1 %v2591_v56 }
 0xdd2   : > { %2508 = vmatpush3.bf16.msra.mxu1 %v2591_v56 }
 0xe55   : > { %v1742_v57 = vpop.xlane.xlu0 %1741 }
 0xe56   : > { %v1752_v59 = vmul.f32 0.03125, %v1742_v57  ;;  %v2592_v57 = vld [vmem:[%s2890_s21 + $0x10] sm:$0xff]  }
 0xe57   : > { %v1745_v37 = vpop.xlane.xlu1 %1744  ;;  %2509 = vmatprep.subr.bf16.mxu1 %v2592_v57 }
 0xe58   : > { %v1756_v61 = vsub.f32 %v3122_v48, %v1752_v59  ;;  %v1753_v0 = vmul.f32 0.03125, %v1745_v37  ;;  %2510 = vmatpush3.bf16.msra.mxu1 %v2592_v57  ;;  %v2593_v59 = vld [vmem:[%s2890_s21 + $0x18] sm:$0xff]   ;;  %v2594_v37 = vld [vmem:[%s2890_s21 + $0x20] sm:$0xff]  }
 0xe59   : > { %v1748_v2 = vpop.xlane.xlu0 %1747  ;;  %2511 = vmatprep.subr.bf16.mxu1 %v2593_v59  ;;  %v2316_v57 = vld [vmem:[%s3236_s8 + $0x1] ss:$0 sm:$0xff] (!%p2312_p9) }
 0xe5a   : > { %v1757_v3 = vsub.f32 %v3126_v52, %v1753_v0  ;;  %v1754_v33 = vmul.f32 0.03125, %v1748_v2  ;;  %v1760_v4 = vmul.f32 %v1756_v61, %v1756_v61  ;;  %v2596_v0 = vld [vmem:[%s2890_s21 + $0x30] sm:$0xff]   ;;  %v2597_v2 = vld [vmem:[%s2890_s21 + $0x38] sm:$0xff]  }
 0xe5c   : > { %v1758_v36 = vsub.f32 %v3124_v50, %v1754_v33  ;;  %v1764_v5 = vsel %vm485_vm7, %v1760_v4, 0.0  ;;  %v1761_v7 = vmul.f32 %v1757_v3, %v1757_v3  ;;  %2512 = vmatpush3.bf16.msra.mxu1 %v2593_v59 }
 0xe5d   : > { %1765 = vadd.xlane.f32.xlu0 %v1764_v5  ;;  %v1751_v60 = vpop.xlane.xlu0 %1750  ;;  %2513 = vmatprep.subr.bf16.mxu1 %v2594_v37 }
 0xe5e   : > { %v1755_v62 = vmul.f32 0.03125, %v1751_v60  ;;  %v1767_v63 = vsel %vm485_vm7, %v1761_v7, 0.0  ;;  %v1762_v1 = vmul.f32 %v1758_v36, %v1758_v36 }
 0xe5f   : > { %1768 = vadd.xlane.f32.xlu1 %v1767_v63 }
 0xe60   : > { %v1759_v6 = vsub.f32 %v3132_v54, %v1755_v62  ;;  %v1770_v8 = vsel %vm485_vm7, %v1762_v1, 0.0  ;;  %2514 = vmatpush3.bf16.msra.mxu1 %v2594_v37 }
 0xe61   : > { %1771 = vadd.xlane.f32.xlu0 %v1770_v8 }
 0xe62   : > { %v1763_v9 = vmul.f32 %v1759_v6, %v1759_v6 }
 0xe64   : > { %v1773_v10 = vsel %vm485_vm7, %v1763_v9, 0.0 }
 0xe65   : > { %1774 = vadd.xlane.f32.xlu1 %v1773_v10 }
 0xeea   : > { %v1766_v13 = vpop.xlane.xlu0 %1765 }
 0xeeb   : > { %v1776_v14 = vmul.f32 0.03125, %v1766_v13 }
 0xeec   : > { %v1769_v15 = vpop.xlane.xlu1 %1768 }
 0xeed   : > { %v1780_v16 = vadd.f32 1e-05, %v1776_v14  ;;  %v1777_v17 = vmul.f32 0.03125, %v1769_v15 }
 0xeee   : > { %v1772_v18 = vpop.xlane.xlu0 %1771 }
 0xeef   : > { %2670 = vrsqrt.f32 %v1780_v16  ;;  %v1781_v19 = vadd.f32 1e-05, %v1777_v17  ;;  %v1778_v20 = vmul.f32 0.03125, %v1772_v18 }
 0xef1   : > { %2672 = vrsqrt.f32 %v1781_v19  ;;  %v1782_v22 = vadd.f32 1e-05, %v1778_v20 }
 0xef2   : > { %v1775_v23 = vpop.xlane.xlu1 %1774 }
 0xef3   : > { %2674 = vrsqrt.f32 %v1782_v22  ;;  %v1779_v24 = vmul.f32 0.03125, %v1775_v23 }
 0xef5   : > { %v1783_v25 = vadd.f32 1e-05, %v1779_v24  ;;  %v1923_v24 = vsub.s32 5, %v2926_v58 }
 0xef7   : > { %2676 = vrsqrt.f32 %v1783_v25  ;;  %v1924_v21 = vrot.slane %v3119_v34, %v1923_v24 }
 0xef9   : > { %v2671_v28 = vpop.eup %2670 }
 0xefa   : > { %v1788_v29 = vmul.f32 %v2671_v28, %v1756_v61  ;;  %v2595_v61 = vld [vmem:[%s2890_s21 + $0x28] sm:$0xff]   ;;  %s2036_s21 = scalar_lea.vmem (!%p2312_p9), [#allocation2], %s2035_s15 }
 0xefb   : > { %v2673_v30 = vpop.eup %2672  ;;  %2515 = vmatprep.subr.bf16.mxu1 %v2595_v61 }
 0xefc   : > { %v1789_v31 = vmul.f32 %v2673_v30, %v1757_v3  ;;  %v1796_v32 = vmul.f32 %v1795_v26, %v1788_v29  ;;  %2516 = vmatpush3.bf16.msra.mxu1 %v2595_v61  ;;  %v1816_v3 = vsub.s32 6, %v2926_v58 }
 0xefd   : > { %v2675_v39 = vpop.eup %2674  ;;  %2517 = vmatprep.subr.bf16.mxu1 %v2596_v0 }
 0xefe   : > { %v1790_v40 = vmul.f32 %v2675_v39, %v1758_v36  ;;  %v1797_v41 = vmul.f32 %v1795_v26, %v1789_v31  ;;  %v1804_v42 = vadd.f32 %v1803_v35, %v1796_v32  ;;  %v1817_v33 = vrot.slane %v3119_v34, %v1816_v3 }
 0xf00   : > { %v1805_v44 = vadd.f32 %v1803_v35, %v1797_v41  ;;  %v1798_v47 = vmul.f32 %v1795_v26, %v1790_v40  ;;  %2518 = vmatpush3.bf16.msra.mxu1 %v2596_v0 }
 0xf01   : > { %v2677_v46 = vpop.eup %2676  ;;  %2519 = vmatprep.subr.bf16.mxu1 %v2597_v2 }
 0xf02   : > { %v1791_v49 = vmul.f32 %v2677_v46, %v1759_v6  ;;  %v1808_v43 = vpack.c.bf16 %v1805_v44, %v1804_v42  ;;  %v1806_v45 = vadd.f32 %v1803_v35, %v1798_v47  ;;  %v2691_v47 = vld [vmem:[%s3237_s9] sm:$0xff] (!%p2312_p9)  }
 0xf04   : > { %v1799_v51 = vmul.f32 %v1795_v26, %v1791_v49  ;;  %2501 = vmatprep.mubr.msk.bf16.mxu0 %vm485_vm7, %v1808_v43  ;;  %2520 = vmatpush3.bf16.msra.mxu1 %v2597_v2  ;;  %v2779_v49 = vmov (!%p2312_p9), 0.0   ;;  %v2692_v43 = vld [vmem:[%s3237_s9 + $0x8] sm:$0xff] (!%p2312_p9)  }
 0xf05   : > { %2525 = vmatprep.subr.bf16.mxu0 (!%p2312_p9), %v2779_v49 }
 0xf06   : > { %v1807_v38 = vadd.f32 %v1803_v35, %v1799_v51 }
 0xf08   : > { %v1809_v53 = vpack.c.bf16 %v1807_v38, %v1806_v45 }
 0xf0a   : > { %2502 = vmatmul.mubr.msk.bf16.vlgmr.msra.gmra.mrb[40].mxu0 %vm485_vm7, %v1809_v53 }
 0xf0b   : > { %2529 = vmatprep.mubr.msk.bf16.mxu0 (!%p2312_p9), %vm2780_vm0, %v2779_v49  ;;  %2526 = vmatpush3.bf16.msra.mxu0 (!%p2312_p9), %v2691_v47 }
 0xf0c   : > { %2527 = vmatprep.subr.bf16.mxu0 (!%p2312_p9), %v2779_v49 }
 0xf0f   : > { %2528 = vmatpush3.bf16.msra.mxu0 (!%p2312_p9), %v2692_v43 }
 0xfdd   : > { %v2503_v4 = vpop.f32.mrb[40].mxu0 }
 0xfde   : > { %v1870_v36 = vpop.f32.mrb[41].mxu0  ;;  %v1879_v7 = vadd.f32 %v2503_v4, %v1817_v33 }
 0xfdf   : > { %v2504_v5 = vpop.f32.mrb[42].mxu0  ;;  %v1871_v63 = vadd.f32 %v1870_v36, %v1817_v33 }
 0xfe0   : > { %v1882_v60 = vadd.f32 %v2504_v5, %v1817_v33  ;;  %v1873_v62 = vpop.f32.mrb[43].mxu0 }
 0xfe1   : > { %v1874_v1 = vadd.f32 %v1873_v62, %v1817_v33 }
 0xfe2   : > { %v1886_v6 = vpack.c.bf16 %v1882_v60, %v1879_v7 }
 0xfe3   : > { %v1885_v8 = vpack.c.bf16 %v1874_v1, %v1871_v63 }
 0xfe4   : > { %v2303_v9 = vmul.bf16 3218784218, %v1886_v6 }
 0xfe5   : > { %v2302_v10 = vmul.bf16 3218784218, %v1885_v8 }
 0xfe6   : > { %v1895_v11 = vmul.bf16 1069105081, %v2303_v9 }
 0xfe7   : > { %v1892_v12 = vmul.bf16 1069105081, %v2302_v10 }
 0xfe8   : > { %2678 = vpow.bf16 %v1895_v11 }
 0xfe9   : > { %2680 = vpow.bf16 %v1892_v12 }
 0xff3   : > { %v2679_v13 = vpop.eup %2678 }
 0xff4   : > { %v2681_v14 = vpop.eup %2680  ;;  %v1898_v15 = vadd.bf16 1065369472, %v2679_v13 }
 0xff5   : > { %v1897_v16 = vadd.bf16 1065369472, %v2681_v14 }
 0xff6   : > { %2682 = vrcp.bf16 %v1898_v15 }
 0xff7   : > { %2684 = vrcp.bf16 %v1897_v16 }
0x1001   : > { %v2683_v17 = vpop.eup %2682 }
0x1002   : > { %v2685_v18 = vpop.eup %2684  ;;  %v1902_v19 = vmul.bf16 1065369472, %v2683_v17 }
0x1003   : > { %v1900_v20 = vmul.bf16 1065369472, %v2685_v18 }
0x1004   : > { %v1904_v23 = vmul.bf16 %v1902_v19, %v1886_v6 }
0x1005   : > { %v1903_v22 = vmul.bf16 %v1900_v20, %v1885_v8 }
0x1007   : > { %2521 = vmatprep.mubr.bf16.mxu1 %v1903_v22 }
0x1008   : > { %2522 = vmatmul.mubr.bf16.vlgmr.msra.gmra.mrb[32].mxu1 %v1904_v23 }
0x10db   : > { %v2523_v25 = vpop.f32.mrb[32].mxu1 }
0x10dc   : > { %v2016_v26 = vadd.f32 %v2523_v25, %v1924_v21  ;;  %v2007_v27 = vpop.f32.mrb[33].mxu1 }
0x10dd   : > { %v2008_v28 = vadd.f32 %v2007_v27, %v1924_v21  ;;  %v2524_v29 = vpop.f32.mrb[34].mxu1  ;;  %2033 = sbr.rel (%p2312_p9) target bundleno = 4869 (0x1305), region = 64 }
0x10de   : > { %v2024_v30 = vadd.f32 %v2016_v26, %v3124_v50  ;;  %v2019_v31 = vadd.f32 %v2524_v29, %v1924_v21  ;;  %v2010_v32 = vpop.f32.mrb[35].mxu1 }
0x10df   : > { %v2022_v35 = vadd.f32 %v2008_v28, %v3122_v48  ;;  %v2011_v39 = vadd.f32 %v2010_v32, %v1924_v21 }
0x10e0   : > { %2028 = vst.msk [vmem:[#allocation2 + $0x10] sm:$0xff] %vm485_vm7, %v2024_v30  ;;  %v2025_v40 = vadd.f32 %v2019_v31, %v3132_v54 }
0x10e1   : > { %2026 = vst.msk [vmem:[#allocation2] sm:$0xff] %vm485_vm7, %v2022_v35  ;;  %v2023_v58 = vadd.f32 %v2011_v39, %v3126_v52 }
0x10e2   : > { %2029 = vst.msk [vmem:[#allocation2 + $0x18] sm:$0xff] %vm485_vm7, %v2025_v40 }
0x10e3   : > { %2027 = vst.msk [vmem:[#allocation2 + $0x8] sm:$0xff] %vm485_vm7, %v2023_v58 }
0x10ea   : > { %v2037_v34 = vld [vmem:[%s2036_s21] sm:$0x1]  ;;  %v2314_v48 = vld [vmem:[%s2196_s11 + $0x10] sm:$0x1] }
0x10eb   : > { %2039 = vst.msk [vmem:[#allocation5] sm:$0x1] %vm2038_vm14, %v2037_v34  ;;  %2045 = vst.msk [vmem:[#allocation5 + $0x1] sm:$0x1] %vm2038_vm14, %v2314_v48 }
0x10f2   : > { %v2046_v50 = vld [vmem:[#allocation5] sm:$0x3] }
0x10f3   : > { %v2050_v52 = vsel %vm2049_vm15, %v2046_v50, 0.0 }
0x10f4   : > { %2051 = vadd.xlane.f32.xlu0 %v2050_v52 }
0x1181   : > { %v2052_v54 = vpop.xlane.xlu0 %2051 }
0x1182   : > { %v2053_v41 = vmul.f32 0.03125, %v2052_v54 }
0x1184   : > { %v2054_v42 = vsub.f32 %v2046_v50, %v2053_v41 }
0x1186   : > { %v2055_v44 = vmul.f32 %v2054_v42, %v2054_v42 }
0x1188   : > { %v2056_v46 = vsel %vm2049_vm15, %v2055_v44, 0.0 }
0x1189   : > { %2057 = vadd.xlane.f32.xlu0 %v2056_v46 }
0x1216   : > { %v2058_v51 = vpop.xlane.xlu0 %2057 }
0x1217   : > { %v2059_v45 = vmul.f32 0.03125, %v2058_v51 }
0x1219   : > { %v2060_v38 = vadd.f32 1e-05, %v2059_v45 }
0x121b   : > { %2693 = vrsqrt.f32 %v2060_v38 }
0x1225   : > { %v2694_v53 = vpop.eup %2693 }
0x1226   : > { %v2062_v56 = vmul.f32 %v2694_v53, %v2054_v42 }
0x1228   : > { %v2067_v59 = vmul.f32 %v2315_v55, %v2062_v56 }
0x122a   : > { %v2072_v37 = vadd.f32 %v2316_v57, %v2067_v59 }
0x122c   : > { %v2073_v61 = vpack.c.bf16 %v2072_v37, %v2072_v37 }
0x122e   : > { %2530 = vmatmul.mubr.msk.bf16.vlgmr.msra.gmra.mrb[0].mxu0 %vm485_vm7, %v2073_v61 }
0x1301   : > { %v2127_v0 = vpop.f32.mrb[0].mxu0 }
0x1302   : > { %2133 = vst.msk [vmem:[#allocation8] sm:$0x3] %vm2049_vm15, %v2127_v0  ;;  %v2531_v2 = vpop.f32.mrb[1].mxu0 }
0x1303   : > { %v2130_v3 = vpop.f32.mrb[2].mxu0 }
0x1304   : > { %v2532_v33 = vpop.f32.mrb[3].mxu0 }
0x1305 PF: > { %s3239_s27 = sadd.s32 4294967295, %s2759_s25   ;;  %s2781_s20 = smov [#allocation8]  }
0x1306   : > { %p3193_p10 = scmp.eq.s32.totalorder %s3239_s27, 1  ;;  %s2143_s22 = sshll.u32 %s2781_s20, 4  ;;  %s2144_s22 = int_to_ptr.vmem [resolvable:$true] %s2143_s22 }
0x1307   : > { %s2705_s30 = scalar_lea.vmem %s2144_s22, 32  ;;  %p2712_p0 = scmp.lt.s32.totalorder %s2144_s22, %s2144_s22 }
0x1308   : > { %p2706_p11 = scmp.ne.s32.totalorder %s2144_s22, %s2705_s30  ;;  %p2713_p1 = scmp.lt.s32.totalorder %s2705_s30, %s2705_s30 }
0x130a   : > { %p2707_p12 = pnand %p2706_p11, %p3193_p10  ;;  %p2714_p2 = por %p2713_p1, %p2712_p0 }
0x130c   : > { %p2708_p13 = pneg %p2707_p12 }
0x130e   : > { %p2715_p3 = pnand %p2714_p2, %p2708_p13 }
0x1310   : > { %2718 = shalt.err (!%p2715_p3)
}
0x1311   : > { %s2719_s18 = scalar_lea.hbm %s3238_s10, 32 }
0x1312   : > { %p2720_p4 = scmp.ne.s32.totalorder %s3238_s10, %s2719_s18  ;;  %p2725_p7 = scmp.lt.u32.totalorder %s2719_s18, %s3238_s10 }
0x1314   : > { %p2721_p5 = pnand %p2720_p4, %p3193_p10 }
0x1316   : > { %p2722_p6 = pneg %p2721_p5 }
0x1318   : > { %p2727_p8 = pnand %p2725_p7, %p2722_p6 }
0x131a   : > { %2730 = shalt.err (!%p2727_p8)
}
0x131b   : > { %2534 = dma.vmem_to_hbm [thread:$0]  (%p3193_p10), %s2144_s22, 32, %s3238_s10, [#allocation9]  }
0x131c   : > { %2746 = dma.done.wait (%p3193_p10), [#allocation9], 32  }
0x131d   : > { %2748 = vsyncadd (%p3193_p10), [#allocation9], 4294967264 }
0x131e PF: > { %s25_s25 = sadd.s32 1, %s2759_s25   ;;  %s3241_s23 = smov %s2755_s24 }
0x131f   : > { %p22_p9 = scmp.ge.s32.totalorder %s25_s25, 4   ;;  %s3242_s24 = smov %s3244_s26 }
0x1321   :  { %24 = sbr.rel (!%p22_p9) target bundleno = 14 (0xe), region = 109 }
0x1328   :  { %2156 = vsyncpa [#allocation9], 1 }
0x1329   :  { %2158 = vsyncpa [#allocation9 + $0x1], 1 }

</bundles_post_ra>
